<compile_context>
chip_gen: v5e
topology: v5e:2x2
jax: 0.10.0
libtpu: 0.0.40
codegen_flags: <defaults>
</compile_context>

<pallas_src>
from itertools import combinations

import numpy as np
import jax
import jax.numpy as jnp
from jax.experimental import pallas as pl
from jax.experimental.pallas import tpu as pltpu

# ----------------------------- static config -------------------------------
N = 2             # batch
C = 1             # channels (BatchNorm2d channel dim; ts_pool4d assumes C == 1)
W = 4             # width  : number of base series
H = 16            # height : time length
STRIDE_CNN = 4    # rolling-window length for the "conv" features
STRIDE_POOL = 4   # pooling window along time
FC1 = 32          # fc_neuron[0]
FCAST = 1         # fc_neuron[1]
BN_EPS = 1e-5     # nn.BatchNorm2d default eps

COMB = list(combinations(range(W), 2))      # static pair list, as in the module
NCOMB = len(COMB)                           # 6
CYCLE = H - STRIDE_CNN + 1                  # 13 valid rolling positions
F_FEAT = 2 * NCOMB + 5 * W                  # 32 = cat([cov,corr,std,decay,z,ret,ret])
NFEAT = 2 * NCOMB + 4 * W                   # 28 distinct feature rows (ret counted once)
RET0 = 2 * NCOMB + 3 * W                    # 24: first torch feature index of the ret block
NW = N * W                                  # 8 rows of the reshaped input


def _ceil8(n):
    return ((n + 7) // 8) * 8


PAIR_PAD = _ceil8(N * NCOMB)                # 16: pair blocks padded to a sublane tile
NROWS_P = 2 * PAIR_PAD + 4 * NW             # 64: padded rows of the in-kernel conv map


def _pool_steps(length, stride):
    """Replicates ts_pool4d's step_list construction (final if/elif/else)."""
    if length % stride == 0:
        return list(range(0, length + stride, stride))
    mod = length % stride
    if mod <= 5:
        return list(range(0, length - stride, stride)) + [length]
    return list(range(0, length + stride - mod, stride)) + [length]


STEPS = _pool_steps(CYCLE, STRIDE_POOL)     # [0, 4, 8, 13]
NPOOL = len(STEPS) - 1                      # 3
FLAT = 3 * F_FEAT * NPOOL                   # 288 = flatten_node

_decay = np.arange(1, STRIDE_CNN + 1, dtype=np.float64)
DECAY_W = tuple((_decay / _decay.sum()).tolist())   # ts_decay4d weights

SLAB_W = 64                                 # lane width of the packed constant slab


# ------------------------- static operand slab --------------------------
def _build_statics():
    # band filters: cols [0:CYCLE] rolling sum, cols [CYCLE:2*CYCLE] decay weights
    bande = np.zeros((H, 2 * CYCLE), np.float32)
    for c in range(CYCLE):
        for k in range(STRIDE_CNN):
            bande[c + k, c] = 1.0
            bande[c + k, CYCLE + c] = DECAY_W[k]

    # pair-member selectors: rows [0:PAIR_PAD] -> member i, [PAIR_PAD:] -> member j
    # (rows 12..15 of each half are zero padding so downstream blocks stay 8-aligned)
    selall = np.zeros((2 * PAIR_PAD, NW), np.float32)
    for n in range(N):
        for p, (i, j) in enumerate(COMB):
            selall[n * NCOMB + p, n * W + i] = 1.0
            selall[PAIR_PAD + n * NCOMB + p, n * W + j] = 1.0

    # row bookkeeping of the padded conv map (block, batch-outer, feature-inner)
    row_feat = np.full(NROWS_P, -1, np.int32)
    row_batch = np.full(NROWS_P, -1, np.int32)
    map_id = np.full(NROWS_P, -1, np.int32)
    blocks = [(NCOMB, 0, PAIR_PAD), (NCOMB, NCOMB, PAIR_PAD),
              (W, 2 * NCOMB, NW), (W, 2 * NCOMB + W, NW),
              (W, 2 * NCOMB + 2 * W, NW), (W, RET0, NW)]
    r0 = 0
    for m, (k, base, pad) in enumerate(blocks):
        for n in range(N):
            for f in range(k):
                r = r0 + n * k + f
                row_feat[r] = base + f
                row_batch[r] = n
                map_id[r] = m
        r0 += pad

    # batched per-map BatchNorm helpers
    gmean6 = np.zeros((6, NROWS_P), np.float32)      # per-map mean weights (1/count)
    gmapT = np.zeros((NROWS_P, 6), np.float32)       # row -> map one-hot (zero on pad rows)
    for m, (k, _, _) in enumerate(blocks):
        rows = map_id == m
        gmean6[m, rows] = 1.0 / (N * k * CYCLE)
        gmapT[rows, m] = 1.0

    # mean-pooling weights over the CYCLE segments
    segmean = np.zeros((CYCLE, NPOOL), np.float32)
    for k in range(NPOOL):
        lo, hi = STEPS[k], STEPS[k + 1]
        segmean[lo:hi, k] = 1.0 / (hi - lo)

    # batched pooled-BatchNorm helpers: the duplicated ts_return map (bn6 == bn7)
    # counts twice in the pooled statistics -> ret rows weighted 2x.
    wrowT = np.where(map_id == 5, 2.0,
                     np.where(map_id >= 0, 1.0, 0.0)).astype(np.float32)[None, :]
    cnt = float(N * F_FEAT * NPOOL)                  # 192 elements per pooled map
    g18x6 = np.zeros((6 * NPOOL, 6), np.float32)     # column sums -> [mu(3) | E[x^2](3)]
    b6x18 = np.zeros((6, 6 * NPOOL), np.float32)     # [mu(3) | inv(3)] -> per-column broadcast
    for g in range(3):
        for p_ in range(NPOOL):
            g18x6[NPOOL * g + p_, g] = 1.0 / cnt
            g18x6[3 * NPOOL + NPOOL * g + p_, 3 + g] = 1.0 / cnt
            b6x18[g, NPOOL * g + p_] = 1.0
            b6x18[3 + g, 3 * NPOOL + NPOOL * g + p_] = 1.0

    bmaskT = (row_batch[None, :] == np.arange(N)[:, None]).astype(np.float32)  # [N, NROWS_P]

    # pack every static operand into ONE padded f32 slab (1 DMA instead of 9)
    parts, offs, r = [], {}, 0
    for name, arr in (("bande", bande), ("selall", selall), ("gmean6", gmean6),
                      ("gmapT", gmapT), ("segmean", segmean), ("wrowT", wrowT),
                      ("g18x6", g18x6), ("b6x18", b6x18), ("bmaskT", bmaskT)):
        offs[name] = r
        rows = _ceil8(arr.shape[0])
        blk = np.zeros((rows, SLAB_W), np.float32)
        blk[:arr.shape[0], :arr.shape[1]] = arr
        parts.append(blk)
        r += rows
    slab = np.concatenate(parts, axis=0)             # [184, 64] f32, every block 8-aligned
    return jnp.asarray(slab), offs, row_feat


_CSLAB, _OFF, _ROW_FEAT = _build_statics()


def fold_params(w1, b1, w2, b2):
    """Fold the MLP parameters into the kernel layout.

    Called ONCE per weight set (hoisted out of the per-call forward path).
    fc1 weights are rearranged to [3*NPOOL, NROWS_P, FC1]; the two weight
    blocks of the duplicated ts_return map (bn6 == bn7) are summed so the map
    is only computed once in-kernel.  Pad rows get zero weight.
    """
    w1 = jnp.asarray(w1, jnp.float32)
    # torch flat index = g*(F_FEAT*NPOOL) + f*NPOOL + p  with g in (max, min, mean)
    w1r = w1.reshape(3, F_FEAT, NPOOL, FC1)
    w1m = jnp.concatenate(
        [w1r[:, :RET0], w1r[:, RET0:RET0 + W] + w1r[:, RET0 + W:]], axis=1)  # [3, NFEAT, NPOOL, FC1]
    feat = jnp.asarray(np.where(_ROW_FEAT >= 0, _ROW_FEAT, 0), jnp.int32)
    valid = jnp.asarray((_ROW_FEAT >= 0).astype(np.float32))[None, :, None]
    wq = jnp.transpose(w1m[:, feat, :, :], (0, 2, 1, 3)).reshape(
        3 * NPOOL, NROWS_P, FC1) * valid                                     # [9, NROWS_P, FC1]
    return (wq,
            jnp.asarray(b1, jnp.float32).reshape(1, FC1),
            jnp.asarray(w2, jnp.float32).reshape(FC1, FCAST),
            jnp.asarray(b2, jnp.float32).reshape(1, FCAST))


# ------------------------------ Pallas kernel --------------------------------
def alphanet_kernel(x_ref, c_ref, wq_ref, b1_ref, w2_ref, b2_ref, out_ref):
    f32 = jnp.float32
    o = _OFF                                                      # static Python offsets
    x = x_ref[...]                                                # [NW, H]

    # static views into the packed constant slab (all sublane starts 8-aligned)
    bande = c_ref[o["bande"]:o["bande"] + H, 0:2 * CYCLE]                    # [H, 2*CYCLE]
    bsum = bande[:, 0:CYCLE]
    selall = c_ref[o["selall"]:o["selall"] + 2 * PAIR_PAD, 0:NW]             # [2*PAIR_PAD, NW]
    gmean6 = c_ref[o["gmean6"]:o["gmean6"] + 6, 0:NROWS_P]                   # [6, NROWS_P]
    gmapT = c_ref[o["gmapT"]:o["gmapT"] + NROWS_P, 0:6]                      # [NROWS_P, 6]
    segmean = c_ref[o["segmean"]:o["segmean"] + CYCLE, 0:NPOOL]              # [CYCLE, NPOOL]
    wrowT = c_ref[o["wrowT"]:o["wrowT"] + 1, 0:NROWS_P]                      # [1, NROWS_P]
    g18x6 = c_ref[o["g18x6"]:o["g18x6"] + 6 * NPOOL, 0:6]                    # [18, 6]
    b6x18 = c_ref[o["b6x18"]:o["b6x18"] + 6, 0:6 * NPOOL]                    # [6, 18]
    bmaskT = c_ref[o["bmaskT"]:o["bmaskT"] + N, 0:NROWS_P]                   # [N, NROWS_P]

    # --- rolling window sum / sum-of-squares / decay in ONE band matmul -----
    inv_s = 1.0 / STRIDE_CNN
    roll = jnp.dot(jnp.concatenate([x, x * x], axis=0), bande,
                   preferred_element_type=f32)                               # [2*NW, 2*CYCLE]
    mean = roll[0:NW, 0:CYCLE] * inv_s
    ex2 = roll[NW:2 * NW, 0:CYCLE] * inv_s
    # ddof=0 on purpose: reference uses np.nanstd / bottleneck move_std (population)
    std = jnp.sqrt(jnp.maximum(ex2 - mean * mean, 0.0))
    dec = roll[0:NW, CYCLE:2 * CYCLE]                                        # ts_decay4d

    last = x[:, STRIDE_CNN - 1:]                                             # [NW, CYCLE]
    first = x[:, :CYCLE]
    z = (last - mean) / (std + 1e-9)                                         # ts_zscore4d
    ret = last / (first - 1.0) + 1e-9                                        # ts_return4d (as written)
    ret = jnp.where(jnp.isinf(ret), 1e6, ret)
    ret = jnp.where(jnp.isnan(ret), 1e6, ret)   # guard 0/0 (reference would propagate NaN)

    # --- pairwise cov / corr: ONE fused selection matmul + band matmul -------
    sel = jnp.dot(selall, jnp.concatenate([x, mean, std], axis=1),
                  preferred_element_type=f32)                                # [2*PAIR_PAD, H+2*CYCLE]
    xi = sel[0:PAIR_PAD, 0:H]
    xj = sel[PAIR_PAD:2 * PAIR_PAD, 0:H]
    mi = sel[0:PAIR_PAD, H:H + CYCLE]
    mj = sel[PAIR_PAD:2 * PAIR_PAD, H:H + CYCLE]
    si = sel[0:PAIR_PAD, H + CYCLE:]
    sj = sel[PAIR_PAD:2 * PAIR_PAD, H + CYCLE:]
    psum = jnp.dot(xi * xj, bsum, preferred_element_type=f32)                # [PAIR_PAD, CYCLE]
    cov = (psum - STRIDE_CNN * mi * mj) / (STRIDE_CNN - 1)                   # ts_cov4d (sample cov)
    corr = cov / (si * sj + 1e-9)                                            # ts_corr4d (pop. stds)

    # --- training-mode BatchNorm2d(C=1) for all six maps, batched ------------
    # (pad rows carry zero weight in gmean6 / gmapT and stay exactly zero)
    cl = jnp.concatenate([cov, corr, std, dec, z, ret], axis=0)              # [NROWS_P, CYCLE]
    clcat = jnp.concatenate([cl, cl * cl], axis=1)                           # [NROWS_P, 2*CYCLE]
    stat = jnp.dot(gmean6, clcat, preferred_element_type=f32)                # [6, 2*CYCLE]
    mu6 = jnp.sum(stat[:, 0:CYCLE], axis=1, keepdims=True)                   # per-map mean
    e26 = jnp.sum(stat[:, CYCLE:], axis=1, keepdims=True)                    # per-map E[x^2]
    inv6 = jax.lax.rsqrt(jnp.maximum(e26 - mu6 * mu6, 0.0) + BN_EPS)
    rowst = jnp.dot(gmapT, jnp.concatenate([mu6, inv6], axis=1),
                    preferred_element_type=f32)                              # [NROWS_P, 2]
    cl_bn = (cl - rowst[:, 0:1]) * rowst[:, 1:2]

    # --- ts_pool4d: static lane-slice reductions, assembled once -------------
    cols = []
    for op in (jnp.max, jnp.min):
        for k in range(NPOOL):
            lo, hi = STEPS[k], STEPS[k + 1]
            cols.append(op(cl_bn[:, lo:hi], axis=1, keepdims=True))
    cols.append(jnp.dot(cl_bn, segmean, preferred_element_type=f32))
    p = jnp.concatenate(cols, axis=1)                                        # [NROWS_P, 3*NPOOL]

    # --- pooled BatchNorms (max/min/mean), batched; ret rows weighted 2x -----
    pcat = jnp.concatenate([p, p * p], axis=1)                               # [NROWS_P, 18]
    cs = jnp.dot(wrowT, pcat, preferred_element_type=f32)                    # [1, 18]
    gstat = jnp.dot(cs, g18x6, preferred_element_type=f32)                   # [1, 6] = mu | E[x^2]
    mu3 = gstat[:, 0:3]
    inv3 = jax.lax.rsqrt(jnp.maximum(gstat[:, 3:6] - mu3 * mu3, 0.0) + BN_EPS)
    lane = jnp.dot(jnp.concatenate([mu3, inv3], axis=1), b6x18,
                   preferred_element_type=f32)                               # [1, 18]
    p_bn = (p - lane[:, 0:3 * NPOOL]) * lane[:, 3 * NPOOL:]                  # [NROWS_P, 9]

    # --- flatten + fc1 without building the [9*NROWS, N] slab ----------------
    # QT[r, f] = sum_c wq[c, r, f] * p_bn[r, c]  (9 lane-broadcast FMAs, VPU)
    qt = wq_ref[0] * p_bn[:, 0:1]
    for c in range(1, 3 * NPOOL):
        qt = qt + wq_ref[c] * p_bn[:, c:c + 1]                               # [NROWS_P, FC1]
    # TODO(synk): dropout is the identity here (inference) and BatchNorm running
    # statistics are not tracked (forward-only kernel uses batch statistics).
    hT = jnp.maximum(jnp.dot(bmaskT, qt, preferred_element_type=f32)
                     + b1_ref[...], 0.0)                                     # [N, FC1]
    oT = jnp.dot(hT, w2_ref[...], preferred_element_type=f32) + b2_ref[...]  # [N, FCAST]
    out_ref[...] = jax.nn.sigmoid(oT)


# -------------------------------- wrapper ------------------------------------
@jax.jit
def alphanet_forward(x, wq, b1row, w2m, b2row):
    """x: [N, C, W, H]; (wq, b1row, w2m, b2row) = fold_params(...)."""
    assert x.shape == (N, C, W, H) and C == 1
    xf = x[:, 0, :, :].reshape(N * W, H).astype(jnp.float32)

    # Single fused kernel; all operands are KB-scale so no grid is needed.
    # TODO(synk): for realistic batch sizes, add a grid over N (blocks of >=8
    # sublanes) with dimension_semantics=("parallel",) to use both v7x cores,
    # sizing the block against v7x's 64 MiB VMEM.
    return pl.pallas_call(
        alphanet_kernel,
        out_shape=jax.ShapeDtypeStruct((N, FCAST), jnp.float32),
        in_specs=[pl.BlockSpec(memory_space=pltpu.MemorySpace.VMEM)] * 6,
        out_specs=pl.BlockSpec(memory_space=pltpu.MemorySpace.VMEM),
    )(xf, _CSLAB, wq, b1row, w2m, b2row)


# ---------------------------------- main --------------------------------------
if __name__ == "__main__":
    key = jax.random.PRNGKey(0)
    k1, k2, k3 = jax.random.split(key, 3)

    # deterministic synthetic input + parameters (the module's Linear layers)
    x = jax.random.normal(k1, (N, C, W, H), dtype=jnp.float32)
    w1 = jax.random.normal(k2, (FLAT, FC1), dtype=jnp.float32) * 0.05   # fc1.weight.T
    b1 = jnp.zeros((1, FC1), dtype=jnp.float32)                         # fc1.bias
    w2 = jax.random.normal(k3, (FC1, FCAST), dtype=jnp.float32) * 0.1   # out.weight.T
    b2 = jnp.zeros((1, FCAST), dtype=jnp.float32)                       # out.bias

    params = fold_params(w1, b1, w2, b2)        # weight fold hoisted: done once per weight set
    out = jax.block_until_ready(alphanet_forward(x, *params))

    assert out.shape == (N, FCAST)
    assert bool(jnp.all(jnp.isfinite(out)))
    assert bool(jnp.all((out >= 0.0) & (out <= 1.0)))
    print("KERNEL_OK")
</pallas_src>

<mosaic_0001>
module attributes {stable_mosaic.version = 11 : i64} {
  func.func @alphanet_kernel(%arg0: memref<8x16xf32, #tpu.memory_space<vmem>>, %arg1: memref<184x64xf32, #tpu.memory_space<vmem>>, %arg2: memref<9x64x32xf32, #tpu.memory_space<vmem>>, %arg3: memref<1x32xf32, #tpu.memory_space<vmem>>, %arg4: memref<32x1xf32, #tpu.memory_space<vmem>>, %arg5: memref<1x1xf32, #tpu.memory_space<vmem>>, %arg6: memref<2x1xf32, #tpu.memory_space<vmem>>) attributes {dimension_semantics = [], scalar_prefetch = 0 : i64, scratch_operands = 0 : i64, tpu.core_type = #tpu.core_type<tc>} {
    %c0 = arith.constant 0 : index
    %c0_0 = arith.constant 0 : index
    %0 = vector.load %arg0[%c0, %c0_0] : memref<8x16xf32, #tpu.memory_space<vmem>>, vector<8x16xf32>
    %c0_1 = arith.constant 0 : index
    %c0_2 = arith.constant 0 : index
    %1 = vector.load %arg1[%c0_1, %c0_2] : memref<184x64xf32, #tpu.memory_space<vmem>>, vector<16x26xf32>
    %2 = vector.extract_strided_slice %1 {offsets = [0, 0], sizes = [16, 13], strides = [1, 1]} : vector<16x26xf32> to vector<16x13xf32>
    %c16 = arith.constant 16 : index
    %c0_3 = arith.constant 0 : index
    %3 = vector.load %arg1[%c16, %c0_3] : memref<184x64xf32, #tpu.memory_space<vmem>>, vector<32x8xf32>
    %c48 = arith.constant 48 : index
    %c0_4 = arith.constant 0 : index
    %4 = vector.load %arg1[%c48, %c0_4] : memref<184x64xf32, #tpu.memory_space<vmem>>, vector<6x64xf32>
    %c56 = arith.constant 56 : index
    %c0_5 = arith.constant 0 : index
    %5 = vector.load %arg1[%c56, %c0_5] : memref<184x64xf32, #tpu.memory_space<vmem>>, vector<64x6xf32>
    %c120 = arith.constant 120 : index
    %c0_6 = arith.constant 0 : index
    %6 = vector.load %arg1[%c120, %c0_6] : memref<184x64xf32, #tpu.memory_space<vmem>>, vector<13x3xf32>
    %c136 = arith.constant 136 : index
    %c0_7 = arith.constant 0 : index
    %7 = vector.load %arg1[%c136, %c0_7] : memref<184x64xf32, #tpu.memory_space<vmem>>, vector<1x64xf32>
    %c144 = arith.constant 144 : index
    %c0_8 = arith.constant 0 : index
    %8 = vector.load %arg1[%c144, %c0_8] : memref<184x64xf32, #tpu.memory_space<vmem>>, vector<18x6xf32>
    %c168 = arith.constant 168 : index
    %c0_9 = arith.constant 0 : index
    %9 = vector.load %arg1[%c168, %c0_9] : memref<184x64xf32, #tpu.memory_space<vmem>>, vector<6x18xf32>
    %c176 = arith.constant 176 : index
    %c0_10 = arith.constant 0 : index
    %10 = vector.load %arg1[%c176, %c0_10] : memref<184x64xf32, #tpu.memory_space<vmem>>, vector<2x64xf32>
    %11 = arith.mulf %0, %0 : vector<8x16xf32>
    %12 = tpu.concatenate %0, %11 in 0 : vector<8x16xf32>, vector<8x16xf32> -> vector<16x16xf32>
    %cst = arith.constant dense<0.000000e+00> : vector<16x26xf32>
    %13 = tpu.matmul %12, %1, %cst {dimension_numbers = #tpu.dot_dimension_numbers<[1], [0], [0], [1], [0, 0, 1, 1], [], []>} : vector<16x16xf32>, vector<16x26xf32>, vector<16x26xf32> -> vector<16x26xf32>
    %14 = vector.extract_strided_slice %13 {offsets = [0, 0], sizes = [8, 13], strides = [1, 1]} : vector<16x26xf32> to vector<8x13xf32>
    %cst_11 = arith.constant 2.500000e-01 : f32
    %15 = vector.broadcast %cst_11 : f32 to vector<8x13xf32>
    %16 = arith.mulf %14, %15 : vector<8x13xf32>
    %17 = vector.extract_strided_slice %13 {offsets = [8, 0], sizes = [8, 13], strides = [1, 1]} : vector<16x26xf32> to vector<8x13xf32>
    %cst_12 = arith.constant 2.500000e-01 : f32
    %18 = vector.broadcast %cst_12 : f32 to vector<8x13xf32>
    %19 = arith.mulf %17, %18 : vector<8x13xf32>
    %20 = arith.mulf %16, %16 : vector<8x13xf32>
    %21 = arith.subf %19, %20 : vector<8x13xf32>
    %cst_13 = arith.constant 0.000000e+00 : f32
    %22 = vector.broadcast %cst_13 : f32 to vector<8x13xf32>
    %23 = arith.maximumf %21, %22 : vector<8x13xf32>
    %24 = math.sqrt %23 : vector<8x13xf32>
    %25 = vector.extract_strided_slice %13 {offsets = [0, 13], sizes = [8, 13], strides = [1, 1]} : vector<16x26xf32> to vector<8x13xf32>
    %26 = vector.extract_strided_slice %0 {offsets = [0, 3], sizes = [8, 13], strides = [1, 1]} : vector<8x16xf32> to vector<8x13xf32>
    %27 = vector.extract_strided_slice %0 {offsets = [0, 0], sizes = [8, 13], strides = [1, 1]} : vector<8x16xf32> to vector<8x13xf32>
    %28 = arith.subf %26, %16 : vector<8x13xf32>
    %cst_14 = arith.constant 9.99999971E-10 : f32
    %29 = vector.broadcast %cst_14 : f32 to vector<8x13xf32>
    %30 = arith.addf %24, %29 : vector<8x13xf32>
    %31 = arith.divf %28, %30 : vector<8x13xf32>
    %cst_15 = arith.constant 1.000000e+00 : f32
    %32 = vector.broadcast %cst_15 : f32 to vector<8x13xf32>
    %33 = arith.subf %27, %32 : vector<8x13xf32>
    %34 = arith.divf %26, %33 : vector<8x13xf32>
    %cst_16 = arith.constant 9.99999971E-10 : f32
    %35 = vector.broadcast %cst_16 : f32 to vector<8x13xf32>
    %36 = arith.addf %34, %35 : vector<8x13xf32>
    %37 = math.absf %36 : vector<8x13xf32>
    %cst_17 = arith.constant 0x7F800000 : f32
    %38 = vector.broadcast %cst_17 : f32 to vector<8x13xf32>
    %39 = arith.cmpf oeq, %37, %38 : vector<8x13xf32>
    %cst_18 = arith.constant 1.000000e+06 : f32
    %40 = vector.broadcast %cst_18 : f32 to vector<8x13xf32>
    %41 = arith.select %39, %40, %36 : vector<8x13xi1>, vector<8x13xf32>
    %42 = arith.cmpf one, %41, %41 : vector<8x13xf32>
    %cst_19 = arith.constant 1.000000e+06 : f32
    %43 = vector.broadcast %cst_19 : f32 to vector<8x13xf32>
    %44 = arith.select %42, %43, %41 : vector<8x13xi1>, vector<8x13xf32>
    %45 = tpu.concatenate %0, %16, %24 in 1 : vector<8x16xf32>, vector<8x13xf32>, vector<8x13xf32> -> vector<8x42xf32>
    %cst_20 = arith.constant dense<0.000000e+00> : vector<32x42xf32>
    %46 = tpu.matmul %3, %45, %cst_20 {dimension_numbers = #tpu.dot_dimension_numbers<[1], [0], [0], [1], [0, 0, 1, 1], [], []>} : vector<32x8xf32>, vector<8x42xf32>, vector<32x42xf32> -> vector<32x42xf32>
    %47 = vector.extract_strided_slice %46 {offsets = [0, 0], sizes = [16, 16], strides = [1, 1]} : vector<32x42xf32> to vector<16x16xf32>
    %48 = vector.extract_strided_slice %46 {offsets = [16, 0], sizes = [16, 16], strides = [1, 1]} : vector<32x42xf32> to vector<16x16xf32>
    %49 = vector.extract_strided_slice %46 {offsets = [0, 16], sizes = [16, 13], strides = [1, 1]} : vector<32x42xf32> to vector<16x13xf32>
    %50 = vector.extract_strided_slice %46 {offsets = [16, 16], sizes = [16, 13], strides = [1, 1]} : vector<32x42xf32> to vector<16x13xf32>
    %51 = vector.extract_strided_slice %46 {offsets = [0, 29], sizes = [16, 13], strides = [1, 1]} : vector<32x42xf32> to vector<16x13xf32>
    %52 = vector.extract_strided_slice %46 {offsets = [16, 29], sizes = [16, 13], strides = [1, 1]} : vector<32x42xf32> to vector<16x13xf32>
    %53 = arith.mulf %47, %48 : vector<16x16xf32>
    %cst_21 = arith.constant dense<0.000000e+00> : vector<16x13xf32>
    %54 = tpu.matmul %53, %2, %cst_21 {dimension_numbers = #tpu.dot_dimension_numbers<[1], [0], [0], [1], [0, 0, 1, 1], [], []>} : vector<16x16xf32>, vector<16x13xf32>, vector<16x13xf32> -> vector<16x13xf32>
    %cst_22 = arith.constant 4.000000e+00 : f32
    %55 = vector.broadcast %cst_22 : f32 to vector<16x13xf32>
    %56 = arith.mulf %55, %49 : vector<16x13xf32>
    %57 = arith.mulf %56, %50 : vector<16x13xf32>
    %58 = arith.subf %54, %57 : vector<16x13xf32>
    %cst_23 = arith.constant 3.000000e+00 : f32
    %59 = vector.broadcast %cst_23 : f32 to vector<16x13xf32>
    %60 = arith.divf %58, %59 : vector<16x13xf32>
    %61 = arith.mulf %51, %52 : vector<16x13xf32>
    %cst_24 = arith.constant 9.99999971E-10 : f32
    %62 = vector.broadcast %cst_24 : f32 to vector<16x13xf32>
    %63 = arith.addf %61, %62 : vector<16x13xf32>
    %64 = arith.divf %60, %63 : vector<16x13xf32>
    %65 = tpu.concatenate %60, %64, %24, %25, %31, %44 in 0 : vector<16x13xf32>, vector<16x13xf32>, vector<8x13xf32>, vector<8x13xf32>, vector<8x13xf32>, vector<8x13xf32> -> vector<64x13xf32>
    %66 = arith.mulf %65, %65 : vector<64x13xf32>
    %67 = tpu.concatenate %65, %66 in 1 : vector<64x13xf32>, vector<64x13xf32> -> vector<64x26xf32>
    %cst_25 = arith.constant dense<0.000000e+00> : vector<6x26xf32>
    %68 = tpu.matmul %4, %67, %cst_25 {dimension_numbers = #tpu.dot_dimension_numbers<[1], [0], [0], [1], [0, 0, 1, 1], [], []>} : vector<6x64xf32>, vector<64x26xf32>, vector<6x26xf32> -> vector<6x26xf32>
    %69 = vector.extract_strided_slice %68 {offsets = [0, 0], sizes = [6, 13], strides = [1, 1]} : vector<6x26xf32> to vector<6x13xf32>
    %cst_26 = arith.constant dense<0.000000e+00> : vector<6xf32>
    %70 = vector.multi_reduction <add>, %69, %cst_26 [1] : vector<6x13xf32> to vector<6xf32>
    %71 = vector.shape_cast %70 : vector<6xf32> to vector<6x1xf32>
    %72 = vector.extract_strided_slice %68 {offsets = [0, 13], sizes = [6, 13], strides = [1, 1]} : vector<6x26xf32> to vector<6x13xf32>
    %cst_27 = arith.constant dense<0.000000e+00> : vector<6xf32>
    %73 = vector.multi_reduction <add>, %72, %cst_27 [1] : vector<6x13xf32> to vector<6xf32>
    %74 = vector.shape_cast %73 : vector<6xf32> to vector<6x1xf32>
    %75 = arith.mulf %71, %71 : vector<6x1xf32>
    %76 = arith.subf %74, %75 : vector<6x1xf32>
    %cst_28 = arith.constant 0.000000e+00 : f32
    %77 = vector.broadcast %cst_28 : f32 to vector<6x1xf32>
    %78 = arith.maximumf %76, %77 : vector<6x1xf32>
    %cst_29 = arith.constant 9.99999974E-6 : f32
    %79 = vector.broadcast %cst_29 : f32 to vector<6x1xf32>
    %80 = arith.addf %78, %79 : vector<6x1xf32>
    %81 = math.rsqrt %80 : vector<6x1xf32>
    %82 = tpu.concatenate %71, %81 in 1 : vector<6x1xf32>, vector<6x1xf32> -> vector<6x2xf32>
    %cst_30 = arith.constant dense<0.000000e+00> : vector<64x2xf32>
    %83 = tpu.matmul %5, %82, %cst_30 {dimension_numbers = #tpu.dot_dimension_numbers<[1], [0], [0], [1], [0, 0, 1, 1], [], []>} : vector<64x6xf32>, vector<6x2xf32>, vector<64x2xf32> -> vector<64x2xf32>
    %84 = vector.extract_strided_slice %83 {offsets = [0, 0], sizes = [64, 1], strides = [1, 1]} : vector<64x2xf32> to vector<64x1xf32>
    %85 = vector.broadcast %84 : vector<64x1xf32> to vector<64x13xf32>
    %86 = arith.subf %65, %85 : vector<64x13xf32>
    %87 = vector.extract_strided_slice %83 {offsets = [0, 1], sizes = [64, 1], strides = [1, 1]} : vector<64x2xf32> to vector<64x1xf32>
    %88 = vector.broadcast %87 : vector<64x1xf32> to vector<64x13xf32>
    %89 = arith.mulf %86, %88 : vector<64x13xf32>
    %90 = vector.extract_strided_slice %89 {offsets = [0, 0], sizes = [64, 4], strides = [1, 1]} : vector<64x13xf32> to vector<64x4xf32>
    %cst_31 = arith.constant dense<0xFF800000> : vector<64xf32>
    %91 = vector.multi_reduction <maximumf>, %90, %cst_31 [1] : vector<64x4xf32> to vector<64xf32>
    %92 = vector.shape_cast %91 : vector<64xf32> to vector<64x1xf32>
    %93 = vector.extract_strided_slice %89 {offsets = [0, 4], sizes = [64, 4], strides = [1, 1]} : vector<64x13xf32> to vector<64x4xf32>
    %cst_32 = arith.constant dense<0xFF800000> : vector<64xf32>
    %94 = vector.multi_reduction <maximumf>, %93, %cst_32 [1] : vector<64x4xf32> to vector<64xf32>
    %95 = vector.shape_cast %94 : vector<64xf32> to vector<64x1xf32>
    %96 = vector.extract_strided_slice %89 {offsets = [0, 8], sizes = [64, 5], strides = [1, 1]} : vector<64x13xf32> to vector<64x5xf32>
    %cst_33 = arith.constant dense<0xFF800000> : vector<64xf32>
    %97 = vector.multi_reduction <maximumf>, %96, %cst_33 [1] : vector<64x5xf32> to vector<64xf32>
    %98 = vector.shape_cast %97 : vector<64xf32> to vector<64x1xf32>
    %99 = vector.extract_strided_slice %89 {offsets = [0, 0], sizes = [64, 4], strides = [1, 1]} : vector<64x13xf32> to vector<64x4xf32>
    %cst_34 = arith.constant dense<0x7F800000> : vector<64xf32>
    %100 = vector.multi_reduction <minimumf>, %99, %cst_34 [1] : vector<64x4xf32> to vector<64xf32>
    %101 = vector.shape_cast %100 : vector<64xf32> to vector<64x1xf32>
    %102 = vector.extract_strided_slice %89 {offsets = [0, 4], sizes = [64, 4], strides = [1, 1]} : vector<64x13xf32> to vector<64x4xf32>
    %cst_35 = arith.constant dense<0x7F800000> : vector<64xf32>
    %103 = vector.multi_reduction <minimumf>, %102, %cst_35 [1] : vector<64x4xf32> to vector<64xf32>
    %104 = vector.shape_cast %103 : vector<64xf32> to vector<64x1xf32>
    %105 = vector.extract_strided_slice %89 {offsets = [0, 8], sizes = [64, 5], strides = [1, 1]} : vector<64x13xf32> to vector<64x5xf32>
    %cst_36 = arith.constant dense<0x7F800000> : vector<64xf32>
    %106 = vector.multi_reduction <minimumf>, %105, %cst_36 [1] : vector<64x5xf32> to vector<64xf32>
    %107 = vector.shape_cast %106 : vector<64xf32> to vector<64x1xf32>
    %cst_37 = arith.constant dense<0.000000e+00> : vector<64x3xf32>
    %108 = tpu.matmul %89, %6, %cst_37 {dimension_numbers = #tpu.dot_dimension_numbers<[1], [0], [0], [1], [0, 0, 1, 1], [], []>} : vector<64x13xf32>, vector<13x3xf32>, vector<64x3xf32> -> vector<64x3xf32>
    %109 = tpu.concatenate %92, %95, %98, %101, %104, %107, %108 in 1 : vector<64x1xf32>, vector<64x1xf32>, vector<64x1xf32>, vector<64x1xf32>, vector<64x1xf32>, vector<64x1xf32>, vector<64x3xf32> -> vector<64x9xf32>
    %110 = arith.mulf %109, %109 : vector<64x9xf32>
    %111 = tpu.concatenate %109, %110 in 1 : vector<64x9xf32>, vector<64x9xf32> -> vector<64x18xf32>
    %cst_38 = arith.constant dense<0.000000e+00> : vector<1x18xf32>
    %112 = tpu.matmul %7, %111, %cst_38 {dimension_numbers = #tpu.dot_dimension_numbers<[1], [0], [0], [1], [0, 0, 1, 1], [], []>} : vector<1x64xf32>, vector<64x18xf32>, vector<1x18xf32> -> vector<1x18xf32>
    %cst_39 = arith.constant dense<0.000000e+00> : vector<1x6xf32>
    %113 = tpu.matmul %112, %8, %cst_39 {dimension_numbers = #tpu.dot_dimension_numbers<[1], [0], [0], [1], [0, 0, 1, 1], [], []>} : vector<1x18xf32>, vector<18x6xf32>, vector<1x6xf32> -> vector<1x6xf32>
    %114 = vector.extract_strided_slice %113 {offsets = [0, 0], sizes = [1, 3], strides = [1, 1]} : vector<1x6xf32> to vector<1x3xf32>
    %115 = vector.extract_strided_slice %113 {offsets = [0, 3], sizes = [1, 3], strides = [1, 1]} : vector<1x6xf32> to vector<1x3xf32>
    %116 = arith.mulf %114, %114 : vector<1x3xf32>
    %117 = arith.subf %115, %116 : vector<1x3xf32>
    %cst_40 = arith.constant 0.000000e+00 : f32
    %118 = vector.broadcast %cst_40 : f32 to vector<1x3xf32>
    %119 = arith.maximumf %117, %118 : vector<1x3xf32>
    %cst_41 = arith.constant 9.99999974E-6 : f32
    %120 = vector.broadcast %cst_41 : f32 to vector<1x3xf32>
    %121 = arith.addf %119, %120 : vector<1x3xf32>
    %122 = math.rsqrt %121 : vector<1x3xf32>
    %123 = tpu.concatenate %114, %122 in 1 : vector<1x3xf32>, vector<1x3xf32> -> vector<1x6xf32>
    %cst_42 = arith.constant dense<0.000000e+00> : vector<1x18xf32>
    %124 = tpu.matmul %123, %9, %cst_42 {dimension_numbers = #tpu.dot_dimension_numbers<[1], [0], [0], [1], [0, 0, 1, 1], [], []>} : vector<1x6xf32>, vector<6x18xf32>, vector<1x18xf32> -> vector<1x18xf32>
    %125 = vector.extract_strided_slice %124 {offsets = [0, 0], sizes = [1, 9], strides = [1, 1]} : vector<1x18xf32> to vector<1x9xf32>
    %126 = vector.broadcast %125 : vector<1x9xf32> to vector<64x9xf32>
    %127 = arith.subf %109, %126 : vector<64x9xf32>
    %128 = vector.extract_strided_slice %124 {offsets = [0, 9], sizes = [1, 9], strides = [1, 1]} : vector<1x18xf32> to vector<1x9xf32>
    %129 = vector.broadcast %128 : vector<1x9xf32> to vector<64x9xf32>
    %130 = arith.mulf %127, %129 : vector<64x9xf32>
    %c0_43 = arith.constant 0 : index
    %c0_44 = arith.constant 0 : index
    %c0_45 = arith.constant 0 : index
    %131 = vector.load %arg2[%c0_43, %c0_44, %c0_45] : memref<9x64x32xf32, #tpu.memory_space<vmem>>, vector<1x64x32xf32>
    %132 = vector.shape_cast %131 : vector<1x64x32xf32> to vector<64x32xf32>
    %133 = vector.extract_strided_slice %130 {offsets = [0, 0], sizes = [64, 1], strides = [1, 1]} : vector<64x9xf32> to vector<64x1xf32>
    %134 = vector.broadcast %133 : vector<64x1xf32> to vector<64x32xf32>
    %135 = arith.mulf %132, %134 : vector<64x32xf32>
    %c1 = arith.constant 1 : index
    %c0_46 = arith.constant 0 : index
    %c0_47 = arith.constant 0 : index
    %136 = vector.load %arg2[%c1, %c0_46, %c0_47] : memref<9x64x32xf32, #tpu.memory_space<vmem>>, vector<1x64x32xf32>
    %137 = vector.shape_cast %136 : vector<1x64x32xf32> to vector<64x32xf32>
    %138 = vector.extract_strided_slice %130 {offsets = [0, 1], sizes = [64, 1], strides = [1, 1]} : vector<64x9xf32> to vector<64x1xf32>
    %139 = vector.broadcast %138 : vector<64x1xf32> to vector<64x32xf32>
    %140 = arith.mulf %137, %139 : vector<64x32xf32>
    %141 = arith.addf %135, %140 : vector<64x32xf32>
    %c2 = arith.constant 2 : index
    %c0_48 = arith.constant 0 : index
    %c0_49 = arith.constant 0 : index
    %142 = vector.load %arg2[%c2, %c0_48, %c0_49] : memref<9x64x32xf32, #tpu.memory_space<vmem>>, vector<1x64x32xf32>
    %143 = vector.shape_cast %142 : vector<1x64x32xf32> to vector<64x32xf32>
    %144 = vector.extract_strided_slice %130 {offsets = [0, 2], sizes = [64, 1], strides = [1, 1]} : vector<64x9xf32> to vector<64x1xf32>
    %145 = vector.broadcast %144 : vector<64x1xf32> to vector<64x32xf32>
    %146 = arith.mulf %143, %145 : vector<64x32xf32>
    %147 = arith.addf %141, %146 : vector<64x32xf32>
    %c3 = arith.constant 3 : index
    %c0_50 = arith.constant 0 : index
    %c0_51 = arith.constant 0 : index
    %148 = vector.load %arg2[%c3, %c0_50, %c0_51] : memref<9x64x32xf32, #tpu.memory_space<vmem>>, vector<1x64x32xf32>
    %149 = vector.shape_cast %148 : vector<1x64x32xf32> to vector<64x32xf32>
    %150 = vector.extract_strided_slice %130 {offsets = [0, 3], sizes = [64, 1], strides = [1, 1]} : vector<64x9xf32> to vector<64x1xf32>
    %151 = vector.broadcast %150 : vector<64x1xf32> to vector<64x32xf32>
    %152 = arith.mulf %149, %151 : vector<64x32xf32>
    %153 = arith.addf %147, %152 : vector<64x32xf32>
    %c4 = arith.constant 4 : index
    %c0_52 = arith.constant 0 : index
    %c0_53 = arith.constant 0 : index
    %154 = vector.load %arg2[%c4, %c0_52, %c0_53] : memref<9x64x32xf32, #tpu.memory_space<vmem>>, vector<1x64x32xf32>
    %155 = vector.shape_cast %154 : vector<1x64x32xf32> to vector<64x32xf32>
    %156 = vector.extract_strided_slice %130 {offsets = [0, 4], sizes = [64, 1], strides = [1, 1]} : vector<64x9xf32> to vector<64x1xf32>
    %157 = vector.broadcast %156 : vector<64x1xf32> to vector<64x32xf32>
    %158 = arith.mulf %155, %157 : vector<64x32xf32>
    %159 = arith.addf %153, %158 : vector<64x32xf32>
    %c5 = arith.constant 5 : index
    %c0_54 = arith.constant 0 : index
    %c0_55 = arith.constant 0 : index
    %160 = vector.load %arg2[%c5, %c0_54, %c0_55] : memref<9x64x32xf32, #tpu.memory_space<vmem>>, vector<1x64x32xf32>
    %161 = vector.shape_cast %160 : vector<1x64x32xf32> to vector<64x32xf32>
    %162 = vector.extract_strided_slice %130 {offsets = [0, 5], sizes = [64, 1], strides = [1, 1]} : vector<64x9xf32> to vector<64x1xf32>
    %163 = vector.broadcast %162 : vector<64x1xf32> to vector<64x32xf32>
    %164 = arith.mulf %161, %163 : vector<64x32xf32>
    %165 = arith.addf %159, %164 : vector<64x32xf32>
    %c6 = arith.constant 6 : index
    %c0_56 = arith.constant 0 : index
    %c0_57 = arith.constant 0 : index
    %166 = vector.load %arg2[%c6, %c0_56, %c0_57] : memref<9x64x32xf32, #tpu.memory_space<vmem>>, vector<1x64x32xf32>
    %167 = vector.shape_cast %166 : vector<1x64x32xf32> to vector<64x32xf32>
    %168 = vector.extract_strided_slice %130 {offsets = [0, 6], sizes = [64, 1], strides = [1, 1]} : vector<64x9xf32> to vector<64x1xf32>
    %169 = vector.broadcast %168 : vector<64x1xf32> to vector<64x32xf32>
    %170 = arith.mulf %167, %169 : vector<64x32xf32>
    %171 = arith.addf %165, %170 : vector<64x32xf32>
    %c7 = arith.constant 7 : index
    %c0_58 = arith.constant 0 : index
    %c0_59 = arith.constant 0 : index
    %172 = vector.load %arg2[%c7, %c0_58, %c0_59] : memref<9x64x32xf32, #tpu.memory_space<vmem>>, vector<1x64x32xf32>
    %173 = vector.shape_cast %172 : vector<1x64x32xf32> to vector<64x32xf32>
    %174 = vector.extract_strided_slice %130 {offsets = [0, 7], sizes = [64, 1], strides = [1, 1]} : vector<64x9xf32> to vector<64x1xf32>
    %175 = vector.broadcast %174 : vector<64x1xf32> to vector<64x32xf32>
    %176 = arith.mulf %173, %175 : vector<64x32xf32>
    %177 = arith.addf %171, %176 : vector<64x32xf32>
    %c8 = arith.constant 8 : index
    %c0_60 = arith.constant 0 : index
    %c0_61 = arith.constant 0 : index
    %178 = vector.load %arg2[%c8, %c0_60, %c0_61] : memref<9x64x32xf32, #tpu.memory_space<vmem>>, vector<1x64x32xf32>
    %179 = vector.shape_cast %178 : vector<1x64x32xf32> to vector<64x32xf32>
    %180 = vector.extract_strided_slice %130 {offsets = [0, 8], sizes = [64, 1], strides = [1, 1]} : vector<64x9xf32> to vector<64x1xf32>
    %181 = vector.broadcast %180 : vector<64x1xf32> to vector<64x32xf32>
    %182 = arith.mulf %179, %181 : vector<64x32xf32>
    %183 = arith.addf %177, %182 : vector<64x32xf32>
    %cst_62 = arith.constant dense<0.000000e+00> : vector<2x32xf32>
    %184 = tpu.matmul %10, %183, %cst_62 {dimension_numbers = #tpu.dot_dimension_numbers<[1], [0], [0], [1], [0, 0, 1, 1], [], []>} : vector<2x64xf32>, vector<64x32xf32>, vector<2x32xf32> -> vector<2x32xf32>
    %c0_63 = arith.constant 0 : index
    %c0_64 = arith.constant 0 : index
    %185 = vector.load %arg3[%c0_63, %c0_64] : memref<1x32xf32, #tpu.memory_space<vmem>>, vector<1x32xf32>
    %186 = vector.broadcast %185 : vector<1x32xf32> to vector<2x32xf32>
    %187 = arith.addf %184, %186 : vector<2x32xf32>
    %cst_65 = arith.constant 0.000000e+00 : f32
    %188 = vector.broadcast %cst_65 : f32 to vector<2x32xf32>
    %189 = arith.maximumf %187, %188 : vector<2x32xf32>
    %c0_66 = arith.constant 0 : index
    %c0_67 = arith.constant 0 : index
    %190 = vector.load %arg4[%c0_66, %c0_67] : memref<32x1xf32, #tpu.memory_space<vmem>>, vector<32x1xf32>
    %cst_68 = arith.constant dense<0.000000e+00> : vector<2x1xf32>
    %191 = tpu.matmul %189, %190, %cst_68 {dimension_numbers = #tpu.dot_dimension_numbers<[1], [0], [0], [1], [0, 0, 1, 1], [], []>} : vector<2x32xf32>, vector<32x1xf32>, vector<2x1xf32> -> vector<2x1xf32>
    %c0_69 = arith.constant 0 : index
    %c0_70 = arith.constant 0 : index
    %192 = vector.load %arg5[%c0_69, %c0_70] : memref<1x1xf32, #tpu.memory_space<vmem>>, vector<1x1xf32>
    %193 = vector.broadcast %192 : vector<1x1xf32> to vector<2x1xf32>
    %194 = arith.addf %191, %193 : vector<2x1xf32>
    %195 = arith.negf %194 : vector<2x1xf32>
    %196 = math.exp %195 : vector<2x1xf32>
    %cst_71 = arith.constant 1.000000e+00 : f32
    %197 = vector.broadcast %cst_71 : f32 to vector<2x1xf32>
    %198 = arith.addf %197, %196 : vector<2x1xf32>
    %199 = arith.divf %197, %198 : vector<2x1xf32>
    %c0_72 = arith.constant 0 : index
    %c0_73 = arith.constant 0 : index
    %200 = vector.load %arg6[%c0_72, %c0_73] : memref<2x1xf32, #tpu.memory_space<vmem>>, vector<2x1xf32>
    tpu.vector_store %arg6[%c0_72, %c0_73], %199 {strides = array<i32>} : memref<2x1xf32, #tpu.memory_space<vmem>>, vector<2x1xf32>,
    return
  }
}

</mosaic_0001>

<bundles_post_ra>
// kernel: alphanet_forward.1
= control target key start
LH: loop header
LB: loop body
LE: loop exit
PB: predicated region body
PF: predicated region fallthrough
CT: control target
= control target key end

     0   :  { %vm50_vm0 = vcmask 130048   ;;  %s1880_s27 = smov 3   ;;  %s1882_s28 = smov 29   ;;  %vm156_vm3 = vcmask 236544   ;;  %vm158_vm4 = vcmask 64512   ;;  %s2830_s1 = inlined_call_operand.vmem [shape: f32[184,64], index: 1, kind: input, shape index: {}]   ;;  %s2831_s0 = inlined_call_operand.vmem [shape: f32[8,16], index: 0, kind: input, shape index: {}]   ;;  %s2832_s2 = inlined_call_operand.vmem [shape: f32[9,64,32], index: 2, kind: input, shape index: {}]   ;;  %s2833_s3 = inlined_call_operand.vmem [shape: f32[1,32], index: 3, kind: input, shape index: {}]   ;;  %s2834_s4 = inlined_call_operand.vmem [shape: f32[32,1], index: 4, kind: input, shape index: {}]   ;;  %s2835_s5 = inlined_call_operand.<no memory space> [shape: f32[1,1], index: 5, kind: input, shape index: {}]   ;;  %s2836_s6 = inlined_call_operand.vmem [shape: f32[2,1], index: 6, kind: output, shape index: {}]  }
   0x1   :  { %v27_v0 = vld [vmem:[%s2830_s1 + $0x8] sm:$0xff]  ;;  %v26_v1 = vld [vmem:[%s2830_s1] sm:$0xff]  ;;  %v28_v26 = vld [vmem:[%s2830_s1 + $0x10] sm:$0xff]  ;;  %s1883_s13 = smov 125   ;;  %s1884_s14 = smov 112  }
   0x2   :  { %71 = vmatpush.msra.mxu3 %v27_v0  ;;  %v1945_v2 = vld [vmem:[%s2831_s0] sm:$0xff]  ;;  %s1881_s0 = smov 16   ;;  %v29_v28 = vld [vmem:[%s2830_s1 + $0x18] sm:$0xff]  ;;  %v31_v30 = vld [vmem:[%s2830_s1 + $0x28] sm:$0xff]  ;;  %s1885_s15 = smov 99  }
   0x3   :  { %v49_v3 = vmul.f32 %v1945_v2, %v1945_v2  ;;  %v1628_v4 = vadd.f32 -1.0, %v1945_v2  ;;  %v30_v29 = vld [vmem:[%s2830_s1 + $0x20] sm:$0xff]  ;;  %s1886_s16 = smov 115   ;;  %s1888_s17 = smov 13  }
   0x4   :  { %72 = vmatpush.msra.mxu3 %v26_v1 }
   0x5   :  { %1626 = vmatmul.msk.f32.vlgmr.msra.gmra.mxu3 %vm50_vm0, %v1945_v2  ;;  %124 = vrot.lane.b32.xlu1 %v1628_v4, %s1880_s27 }
   0xd   :  { %1627 = vmatmul.msk.f32.gmra.mxu3 %vm50_vm0, %v49_v3 }
  0x77   :  { %v125_v31 = vpop.permute.xlu1 %124 }
  0x78   :  { %v138_v36 = vand.u32 2147483648, %v125_v31  ;;  %vm132_vm5 = vweird.f32 %v125_v31  ;;  %v136_v38 = vand.u32 2147483647, %v125_v31 }
  0x7a   :  { %v139_v39 = vor.u32 1.1754944e-38, %v138_v36  ;;  %vm137_vm8 = vcmp.eq.f32.partialorder %v136_v38, 8.507059e+37 }
  0x88   :  { %v1954_v5 = vpop.f32.mrf.mxu3 }
  0x89   :  { %v80_v6 = vmul.f32 0.25, %v1954_v5 }
  0x8b   :  { %98 = vrot.lane.b32.xlu2 %v80_v6, %s1880_s27  ;;  %148 = vrot.lane.b32.xlu0 %v80_v6, %s1881_s0  ;;  %v82_v9 = vmul.f32 %v80_v6, %v80_v6 }
  0x90   :  { %v77_v7 = vpop.f32.mrf.mxu3 }
  0x91   :  { %v81_v8 = vmul.f32 0.25, %v77_v7 }
  0x93   :  { %v83_v10 = vsub.f32 %v81_v8, %v82_v9 }
  0x95   :  { %v84_v11 = vmax.f32 %v83_v10, 0.0 }
  0x97   :  { %1860 = vrsqrt.f32 %v84_v11  ;;  %vm92_vm1 = vcmp.eq.f32.partialorder %v84_v11, inf  ;;  %v95_v19 = vand.u32 2147483648, %v84_v11  ;;  %vm94_vm2 = vcmp.eq.f32.partialorder %v84_v11, 0.0 }
  0x98   :  { %1862 = vrcp.f32 %v125_v31 }
  0x9d   :  { %v1861_v12 = vpop.eup %1860 }
  0x9e   :  { %v86_v13 = vmul.f32 %v1861_v12, %v84_v11  ;;  %v1863_v32 = vpop.eup %1862 }
  0x9f   :  { %v128_v33 = vmul.f32 %v1863_v32, %v125_v31  ;;  %vm133_vm6 = vweird.f32 %v1863_v32 }
  0xa0   :  { %v87_v14 = vmul.f32 %v1861_v12, %v86_v13  ;;  %vm134_vm7 = vmor %vm132_vm5, %vm133_vm6 }
  0xa1   :  { %v129_v34 = vsub.f32 1.0, %v128_v33 }
  0xa2   :  { %v88_v15 = vmul.f32 0.5, %v87_v14 }
  0xa3   :  { %v130_v35 = vmul.f32 %v1863_v32, %v129_v34 }
  0xa4   :  { %v89_v16 = vsub.f32 1.5, %v88_v15 }
  0xa5   :  { %v131_v37 = vadd.f32 %v1863_v32, %v130_v35 }
  0xa6   :  { %v90_v17 = vmul.f32 %v1861_v12, %v89_v16  ;;  %v1887_v12 = vmov 3.0  }
  0xa7   :  { %v135_v40 = vsel %vm134_vm7, %v1863_v32, %v131_v37 }
  0xa8   :  { %v91_v18 = vmul.f32 %v90_v17, %v84_v11  ;;  %v140_v41 = vsel %vm137_vm8, %v139_v39, %v135_v40  ;;  %vm346_vm8 = vcmask 105472  }
  0xa9   :  { %v141_v42 = vmul.f32 %v140_v41, %v1945_v2 }
  0xaa   :  { %v93_v20 = vsel %vm92_vm1, %v84_v11, %v91_v18 }
  0xab   :  { %v1958_v21 = vsel %vm94_vm2, %v95_v19, %v93_v20  ;;  %v142_v43 = vadd.f32 1e-09, %v141_v42 }
  0xac   :  { %152 = vrot.lane.b32.xlu0 %v1958_v21, %s1882_s28  ;;  %v102_v22 = vadd.f32 1e-09, %v1958_v21  ;;  %v310_v20 = vmul.f32 %v1958_v21, %v1958_v21 }
  0xad   :  { %v143_v44 = vand.u32 2147483647, %v142_v43 }
  0xae   :  { %104 = vrot.lane.b32.xlu1 %v102_v22, %s1880_s27 }
  0xaf   :  { %vm144_vm9 = vcmp.eq.f32.partialorder %v143_v44, inf }
  0xb0   :  { %v145_v45 = vsel %vm144_vm9, 1000000.0, %v142_v43  ;;  %vm355_vm9 = vcmask 523264  }
  0xb1   :  { %vm146_vm10 = vcmp.ne.f32.partialorder %v145_v45, %v145_v45 }
  0xb2   :  { %v147_v46 = vsel %vm146_vm10, 1000000.0, %v145_v45  ;;  %vm379_vm10 = vcmask 103424  }
  0xb6   :  { %303 = vrot.lane.b32.xlu1 %v147_v46, %s1883_s13 }
  0xe5   :  { %v99_v63 = vpop.permute.xlu2 %98 }
  0xe6   :  { %v101_v4 = vsub.f32 %v1945_v2, %v99_v63 }
  0xfd   :  { %v149_v23 = vpop.permute.xlu0 %148 }
  0xfe   :  { %v155_v24 = vsel %vm50_vm0, %v1945_v2, %v149_v23 }
 0x11e   :  { %v153_v25 = vpop.permute.xlu0 %152 }
 0x11f   :  { %v157_v27 = vsel %vm156_vm3, %v155_v24, %v153_v25 }
 0x120   :  { %186 = vmatpush.msra.mxu1 %v157_v27  ;;  %v105_v47 = vpop.permute.xlu1 %104 }
 0x121   :  { %1629 = vmatmul.msk.f32.vlgmr.msra.gmra.mxu1 %vm158_vm4, %v28_v26  ;;  %1864 = vrcp.f32 %v105_v47  ;;  %v118_v59 = vand.u32 2147483648, %v105_v47  ;;  %vm112_vm12 = vweird.f32 %v105_v47  ;;  %v116_v61 = vand.u32 2147483647, %v105_v47 }
 0x122   :  { %222 = vmatpush.msrb.mxu1 %v27_v0  ;;  %1866 = vrcp.f32 %v1887_v12 }
 0x123   :  { %v119_v0 = vor.u32 1.1754944e-38, %v118_v59  ;;  %vm117_vm14 = vcmp.eq.f32.partialorder %v116_v61, 8.507059e+37 }
 0x124   :  { %223 = vmatpush.msrb.mxu1 %v26_v1 }
 0x127   :  { %v1865_v49 = vpop.eup %1864 }
 0x128   :  { %v108_v50 = vmul.f32 %v1865_v49, %v105_v47  ;;  %vm113_vm11 = vweird.f32 %v1865_v49  ;;  %v1867_v2 = vpop.eup %1866 }
 0x129   :  { %1630 = vmatmul.msk.f32.gmra.mxu1 %vm158_vm4, %v29_v28  ;;  %vm114_vm13 = vmor %vm112_vm12, %vm113_vm11  ;;  %v246_v15 = vmul.f32 3.0, %v1867_v2 }
 0x12a   :  { %v109_v52 = vsub.f32 1.0, %v108_v50 }
 0x12b   :  { %v247_v22 = vsub.f32 1.0, %v246_v15 }
 0x12c   :  { %v110_v53 = vmul.f32 %v1865_v49, %v109_v52 }
 0x12d   :  { %v248_v26 = vmul.f32 %v1867_v2, %v247_v22  ;;  %v32_v22 = vld [vmem:[%s2830_s1 + $0x30] sm:$0x3f] }
 0x12e   :  { %v111_v58 = vadd.f32 %v1865_v49, %v110_v53 }
 0x12f   :  { %v249_v35 = vadd.f32 %v1867_v2, %v248_v26 }
 0x130   :  { %v115_v62 = vsel %vm114_vm13, %v1865_v49, %v111_v58  ;;  %vm404_vm13 = vcmask 7168  }
 0x131   :  { %1631 = vmatmul.msk.f32.gmra.mxu1 %vm158_vm4, %v30_v29  ;;  %v120_v3 = vsel %vm117_vm14, %v119_v0, %v115_v62 }
 0x132   :  { %v121_v8 = vmul.f32 %v120_v3, %v101_v4 }
 0x139   :  { %1632 = vmatmul.msk.f32.gmra.mxu1 %vm158_vm4, %v31_v30 }
 0x19e   :  { %v188_v48 = vpop.f32.mrf.mxu1 }
 0x19f   :  { %v231_v54 = vmul.f32 4.0, %v188_v48 }
 0x1a6   :  { %v191_v51 = vpop.f32.mrf.mxu1 }
 0x1a7   :  { %v232_v9 = vmul.f32 4.0, %v191_v51 }
 0x1ae   :  { %v194_v55 = vpop.f32.mrf.mxu1 }
 0x1af   :  { %v200_v56 = vmul.f32 %v194_v55, %v188_v48  ;;  %v233_v57 = vmul.f32 %v231_v54, %v194_v55 }
 0x1b1   :  { %v254_v60 = vadd.f32 1e-09, %v200_v56  ;;  %1633 = vmatmul.msk.f32.vlgmr.msrb.gmra.mxu1 %vm50_vm0, %v200_v56  ;;  %237 = vrot.lane.b32.xlu1 %v233_v57, %s1884_s14 }
 0x1b3   :  { %258 = vrot.lane.b32.xlu0 %v254_v60, %s1885_s15 }
 0x1b6   :  { %v197_v1 = vpop.f32.mrf.mxu1 }
 0x1b7   :  { %v201_v6 = vmul.f32 %v197_v1, %v191_v51  ;;  %v234_v10 = vmul.f32 %v232_v9, %v197_v1 }
 0x1b9   :  { %v255_v7 = vadd.f32 1e-09, %v201_v6  ;;  %1634 = vmatmul.msk.f32.gmra.mxu1 %vm50_vm0, %v201_v6  ;;  %vm250_vm0 = vweird.f32 %v1867_v2 }
 0x1ba   :  { %v251_v45 = vsel %vm250_vm0, %v1867_v2, %v249_v35  ;;  %vm406_vm0 = vcmask 48128  }
 0x1bb   :  { %260 = vrot.lane.b32.xlu2 %v255_v7, %s1885_s15  ;;  %299 = vrot.lane.b32.xlu0 %v121_v8, %s1883_s13 }
 0x1c3   :  { %239 = vrot.lane.b32.xlu2 %v234_v10, %s1884_s14 }
 0x1cb   :  { %295 = vrot.lane.b32.xlu2 %v1954_v5, %s1886_s16  ;;  %v1991_v5 = vpop.permute.xlu1 %303 }
 0x1cc   :  { %v313_v29 = vmul.f32 %v1991_v5, %v1991_v5 }
 0x215   :  { %v261_v11 = vpop.permute.xlu2 %260 }
 0x216   :  { %1868 = vrcp.f32 %v261_v11  ;;  %v290_v43 = vand.u32 2147483648, %v261_v11  ;;  %vm284_vm4 = vweird.f32 %v261_v11  ;;  %v288_v46 = vand.u32 2147483647, %v261_v11 }
 0x218   :  { %v291_v53 = vor.u32 1.1754944e-38, %v290_v43  ;;  %vm289_vm7 = vcmp.eq.f32.partialorder %v288_v46, 8.507059e+37  ;;  %v36_v46 = vld [vmem:[%s2830_s1 + $0x50] sm:$0xff] }
 0x21c   :  { %v1869_v14 = vpop.eup %1868 }
 0x21d   :  { %v240_v13 = vpop.permute.xlu2 %239  ;;  %v280_v18 = vmul.f32 %v1869_v14, %v261_v11  ;;  %vm285_vm1 = vweird.f32 %v1869_v14 }
 0x21e   :  { %vm286_vm6 = vmor %vm284_vm4, %vm285_vm1  ;;  %vm735_vm1 = vcmask 1044480   ;;  %vm614_vm4 = vcmask 105536  }
 0x21f   :  { %v281_v24 = vsub.f32 1.0, %v280_v18 }
 0x221   :  { %v282_v32 = vmul.f32 %v1869_v14, %v281_v24 }
 0x223   :  { %v238_v39 = vpop.permute.xlu1 %237  ;;  %v283_v40 = vadd.f32 %v1869_v14, %v282_v32 }
 0x225   :  { %v259_v16 = vpop.permute.xlu0 %258  ;;  %v1985_v17 = vpop.permute.xlu2 %295  ;;  %v287_v52 = vsel %vm286_vm6, %v1869_v14, %v283_v40  ;;  %vm829_vm6 = vcmask 23552  }
 0x226   :  { %1870 = vrcp.f32 %v259_v16  ;;  %v311_v19 = vmul.f32 %v1985_v17, %v1985_v17  ;;  %v275_v34 = vand.u32 2147483648, %v259_v16  ;;  %v273_v38 = vand.u32 2147483647, %v259_v16 }
 0x227   :  { %vm269_vm2 = vweird.f32 %v259_v16  ;;  %v292_v56 = vsel %vm289_vm7, %v291_v53, %v287_v52  ;;  %v40_v52 = vld [vmem:[%s2830_s1 + $0x70] sm:$0xff]  ;;  %v1890_v53 = vmov 1   ;;  %vm846_vm7 = vcmask 39936  }
 0x228   :  { %v1752_v23 = vpack.i.bf16 %v310_v20, %v311_v19  ;;  %v276_v44 = vor.u32 1.1754944e-38, %v275_v34  ;;  %vm274_vm5 = vcmp.eq.f32.partialorder %v273_v38, 8.507059e+37  ;;  %1772 = vset.pattern.permute.xlu2 %v1890_v53  ;;  %1773 = vset.pattern.permute.xlu0 %v1890_v53 }
 0x22a   :  { %1753 = vrot.lane.b32.xlu1 %v1752_v23, %s1888_s17 }
 0x22c   :  { %v1871_v25 = vpop.eup %1870 }
 0x22d   :  { %v265_v27 = vmul.f32 %v1871_v25, %v259_v16  ;;  %v1994_v28 = vpop.permute.xlu0 %299  ;;  %vm270_vm15 = vweird.f32 %v1871_v25 }
 0x22e   :  { %v312_v30 = vmul.f32 %v1994_v28, %v1994_v28  ;;  %v225_v31 = vpop.f32.mrf.mxu1  ;;  %vm271_vm3 = vmor %vm269_vm2, %vm270_vm15  ;;  %vm431_vm15 = vcmask 1045504   ;;  %vm564_vm2 = vcmask 31744  }
 0x22f   :  { %v266_v33 = vsub.f32 1.0, %v265_v27  ;;  %v243_v42 = vsub.f32 %v225_v31, %v238_v39 }
 0x230   :  { %v1747_v36 = vpack.i.bf16 %v312_v30, %v313_v29 }
 0x231   :  { %v267_v37 = vmul.f32 %v1871_v25, %v266_v33  ;;  %v2002_v50 = vmul.f32 %v251_v45, %v243_v42  ;;  %v33_v42 = vld [vmem:[%s2830_s1 + $0x38] sm:$0xff] }
 0x232   :  { %1748 = vrot.lane.b32.xlu0 %v1747_v36, %s1888_s17 }
 0x233   :  { %v268_v41 = vadd.f32 %v1871_v25, %v267_v37  ;;  %v306_v57 = vmul.f32 %v2002_v50, %v2002_v50 }
 0x235   :  { %v272_v47 = vsel %vm271_vm3, %v1871_v25, %v268_v41  ;;  %vm589_vm3 = vcmask 64544  }
 0x236   :  { %v228_v48 = vpop.f32.mrf.mxu1  ;;  %v277_v49 = vsel %vm274_vm5, %v276_v44, %v272_v47  ;;  %v34_v44 = vld [vmem:[%s2830_s1 + $0x40] sm:$0xff]  ;;  %v1889_v47 = vmov 0   ;;  %vm820_vm5 = vcmask 15360  }
 0x237   :  { %v244_v51 = vsub.f32 %v228_v48, %v240_v13  ;;  %v2007_v55 = vmul.f32 %v277_v49, %v2002_v50  ;;  %1767 = vset.pattern.permute.xlu1 %v1889_v47  ;;  %v37_v48 = vld [vmem:[%s2830_s1 + $0x58] sm:$0xff]  ;;  %v38_v49 = vld [vmem:[%s2830_s1 + $0x60] sm:$0xff] }
 0x239   :  { %v2004_v54 = vmul.f32 %v251_v45, %v244_v51  ;;  %v308_v61 = vmul.f32 %v2007_v55, %v2007_v55  ;;  %v35_v45 = vld [vmem:[%s2830_s1 + $0x48] sm:$0xff] }
 0x23a   :  { %v39_v51 = vld [vmem:[%s2830_s1 + $0x68] sm:$0xff] }
 0x23b   :  { %v307_v58 = vmul.f32 %v2004_v54, %v2004_v54  ;;  %v2014_v59 = vmul.f32 %v292_v56, %v2004_v54 }
 0x23d   :  { %v1762_v60 = vpack.i.bf16 %v306_v57, %v307_v58  ;;  %v309_v62 = vmul.f32 %v2014_v59, %v2014_v59 }
 0x23f   :  { %1763 = vrot.lane.b32.xlu0 %v1762_v60, %s1888_s17  ;;  %v1757_v63 = vpack.i.bf16 %v308_v61, %v309_v62 }
 0x241   :  { %1758 = vrot.lane.b32.xlu2 %v1757_v63, %s1888_s17  ;;  %s1892_s17 = smov 9  }
 0x29b   :  { %v1759_v8 = vpop.permute.xlu2 %1758 }
 0x29c   :  { %v1754_v0 = vpop.permute.xlu1 %1753  ;;  %v1760_v11 = vunpack.i.l.bf16 %v1759_v8  ;;  %v1761_v13 = vunpack.i.h.bf16 %v1759_v8 }
 0x29d   :  { %v1755_v6 = vunpack.i.l.bf16 %v1754_v0  ;;  %v1756_v9 = vunpack.i.h.bf16 %v1754_v0 }
 0x29e   :  { %v350_v14 = vsel %vm346_vm8, %v2014_v59, %v1760_v11  ;;  %v349_v16 = vsel %vm346_vm8, %v2007_v55, %v1761_v13 }
 0x29f   :  { %v352_v12 = vsel %vm346_vm8, %v1985_v17, %v1755_v6  ;;  %v351_v2 = vsel %vm346_vm8, %v1958_v21, %v1756_v9 }
 0x2a4   :  { %v1749_v1 = vpop.permute.xlu0 %1748 }
 0x2a5   :  { %v1751_v3 = vunpack.i.h.bf16 %v1749_v1  ;;  %v1750_v4 = vunpack.i.l.bf16 %v1749_v1  ;;  %v42_v1 = vld [vmem:[%s2830_s1 + $0x80] sm:$0x1f] }
 0x2a6   :  { %1645 = vmatpush.msk.msra.mxu2 %vm735_vm1, %v42_v1 }
 0x2a7   :  { %v354_v7 = vsel %vm346_vm8, %v1991_v5, %v1750_v4  ;;  %v353_v10 = vsel %vm346_vm8, %v1994_v28, %v1751_v3  ;;  %v41_v3 = vld [vmem:[%s2830_s1 + $0x78] sm:$0xff] }
 0x2a8   :  { %367 = vmatpush.msrb.mxu3 %v354_v7  ;;  %754 = vmatpush.msra.mxu2 %v41_v3 }
 0x2aa   :  { %368 = vmatpush.msrb.mxu3 %v353_v10 }
 0x2ac   :  { %369 = vmatpush.msrb.mxu3 %v352_v12 }
 0x2ae   :  { %370 = vmatpush.msrb.mxu3 %v351_v2 }
 0x2b0   :  { %371 = vmatpush.msrb.mxu3 %v350_v14 }
 0x2b1   :  { %v1764_v15 = vpop.permute.xlu0 %1763 }
 0x2b2   :  { %v1766_v18 = vunpack.i.h.bf16 %v1764_v15  ;;  %v1765_v19 = vunpack.i.l.bf16 %v1764_v15  ;;  %372 = vmatpush.msrb.mxu3 %v349_v16 }
 0x2b4   :  { %v348_v20 = vsel %vm346_vm8, %v2004_v54, %v1765_v19  ;;  %v347_v23 = vsel %vm346_vm8, %v2002_v50, %v1766_v18 }
 0x2b5   :  { %373 = vmatpush.msrb.mxu3 %v348_v20 }
 0x2b7   :  { %374 = vmatpush.msrb.mxu3 %v347_v23 }
 0x2b8   :  { %1635 = vmatmul.msk.f32.vlgmr.msrb.gmra.mxu3 %vm355_vm9, %v32_v22 }
 0x33b   :  { %v376_v24 = vpop.f32.mrf.mxu3 }
 0x33c   :  { %384 = vrot.lane.b32.xlu1 %v376_v24, %s1886_s16  ;;  %v380_v25 = vsel %vm379_vm10, %v376_v24, 0.0  ;;  %s1891_s16 = smov 6  }
 0x33d   :  { %381 = vadd.xlane.f32.xlu2 %v380_v25 }
 0x3ae   :  { %v385_v26 = vpop.permute.xlu1 %384 }
 0x3af   :  { %v387_v27 = vsel %vm379_vm10, %v385_v26, 0.0  ;;  %vm939_vm10 = vcmask 1041408  }
 0x3b0   :  { %388 = vadd.xlane.f32.xlu0 %v387_v27  ;;  %v382_v29 = vpop.xlane.xlu2 %381 }
 0x3b1   :  { %v390_v30 = vmul.f32 %v382_v29, %v382_v29 }
 0x423   :  { %v389_v31 = vpop.xlane.xlu0 %388 }
 0x424   :  { %v391_v32 = vsub.f32 %v389_v31, %v390_v30 }
 0x426   :  { %v392_v33 = vmax.f32 %v391_v32, 0.0 }
 0x428   :  { %v393_v34 = vadd.f32 1e-05, %v392_v33 }
 0x42a   :  { %1872 = vrsqrt.f32 %v393_v34  ;;  %vm400_vm12 = vweird.f32 %v393_v34 }
 0x430   :  { %v1873_v35 = vpop.eup %1872 }
 0x431   :  { %v395_v36 = vmul.f32 %v1873_v35, %v393_v34  ;;  %vm401_vm11 = vweird.f32 %v1873_v35 }
 0x432   :  { %vm402_vm14 = vmor %vm400_vm12, %vm401_vm11  ;;  %vm935_vm11 = vcmask 146432  }
 0x433   :  { %v396_v37 = vmul.f32 %v1873_v35, %v395_v36 }
 0x435   :  { %v397_v38 = vmul.f32 0.5, %v396_v37 }
 0x437   :  { %v398_v39 = vsub.f32 1.5, %v397_v38 }
 0x439   :  { %v399_v40 = vmul.f32 %v1873_v35, %v398_v39 }
 0x43b   :  { %v403_v41 = vsel %vm402_vm14, %v1873_v35, %v399_v40 }
 0x43c   :  { %v405_v43 = vsel %vm404_vm13, %v382_v29, %v403_v41 }
 0x43d   :  { %1636 = vmatpush.msk.msra.mxu0 %vm431_vm15, %v405_v43 }
 0x43e   :  { %1637 = vmatmul.msk.f32.vlgmr.msra.gmra.mxu0 %vm406_vm0, %v33_v42 }
 0x446   :  { %1638 = vmatmul.msk.f32.gmra.mxu0 %vm406_vm0, %v34_v44 }
 0x44e   :  { %1639 = vmatmul.msk.f32.gmra.mxu0 %vm406_vm0, %v35_v45 }
 0x456   :  { %1640 = vmatmul.msk.f32.gmra.mxu0 %vm406_vm0, %v36_v46 }
 0x45e   :  { %1641 = vmatmul.msk.f32.gmra.mxu0 %vm406_vm0, %v37_v48 }
 0x466   :  { %1642 = vmatmul.msk.f32.gmra.mxu0 %vm406_vm0, %v38_v49 }
 0x46e   :  { %1643 = vmatmul.msk.f32.gmra.mxu0 %vm406_vm0, %v39_v51 }
 0x476   :  { %1644 = vmatmul.msk.f32.gmra.mxu0 %vm406_vm0, %v40_v52 }
 0x4bb   :  { %v452_v56 = vpop.f32.mrf.mxu0 }
 0x4bc   :  { %478 = vperm.xlu1 %1767, %v452_v56  }
 0x4c3   :  { %v455_v57 = vpop.f32.mrf.mxu0 }
 0x4c4   :  { %1768 = vset.pattern.permute.xlu1 %v1890_v53 }
 0x4c5   :  { %525 = vperm.xlu1 %1768, %v452_v56  }
 0x4cb   :  { %v458_v58 = vpop.f32.mrf.mxu0 }
 0x4cc   :  { %533 = vperm.xlu2 %1772, %v458_v58  }
 0x4cd   :  { %1769 = vset.pattern.permute.xlu1 %v1889_v47 }
 0x4ce   :  { %483 = vperm.xlu1 %1769, %v455_v57  }
 0x4d3   :  { %v461_v60 = vpop.f32.mrf.mxu0 }
 0x4d4   :  { %1775 = vset.pattern.permute.xlu2 %v1889_v47  ;;  %537 = vperm.xlu0 %1773, %v461_v60  }
 0x4d6   :  { %1770 = vset.pattern.permute.xlu1 %v1890_v53 }
 0x4d7   :  { %529 = vperm.xlu1 %1770, %v455_v57  }
 0x4db   :  { %v464_v61 = vpop.f32.mrf.mxu0 }
 0x4dc   :  { %1796 = vset.pattern.permute.xlu0 %v1889_v47 }
 0x4df   :  { %1771 = vset.pattern.permute.xlu1 %v1889_v47 }
 0x4e0   :  { %488 = vperm.xlu1 %1771, %v458_v58  }
 0x4e3   :  { %v467_v62 = vpop.f32.mrf.mxu0 }
 0x4e4   :  { %503 = vperm.xlu2 %1775, %v467_v62  }
 0x4e8   :  { %493 = vperm.xlu1 %1771, %v461_v60  }
 0x4eb   :  { %v470_v63 = vpop.f32.mrf.mxu0 }
 0x4ec   :  { %508 = vperm.xlu2 %1775, %v470_v63  }
 0x4f0   :  { %498 = vperm.xlu1 %1771, %v464_v61  }
 0x4f3   :  { %v473_v0 = vpop.f32.mrf.mxu0 }
 0x4f4   :  { %513 = vperm.xlu2 %1775, %v473_v0  }
 0x4f8   :  { %1774 = vset.pattern.permute.xlu1 %v1890_v53 }
 0x4f9   :  { %541 = vperm.xlu1 %1774, %v464_v61  }
 0x4fc   :  { %1797 = vset.pattern.permute.xlu2 %v1890_v53 }
 0x501   :  { %545 = vperm.xlu1 %1774, %v467_v62  }
 0x509   :  { %549 = vperm.xlu1 %1774, %v470_v63  }
 0x511   :  { %553 = vperm.xlu1 %1774, %v473_v0  }
 0x519   :  { %1798 = vset.pattern.permute.xlu1 %v1889_v47 }
 0x526   :  { %v534_v19 = vpop.permute.xlu2 %533 }
 0x52e   :  { %v479_v4 = vpop.permute.xlu1 %478 }
 0x52f   :  { %v516_v6 = vsub.f32 %v2002_v50, %v479_v4 }
 0x537   :  { %v526_v7 = vpop.permute.xlu1 %525 }
 0x538   :  { %v2096_v8 = vmul.f32 %v526_v7, %v516_v6 }
 0x53a   :  { %1646 = vmatmul.msk.f32.vlgmr.msra.gmra.mxu2 %vm346_vm8, %v2096_v8  ;;  %v565_v9 = vsel %vm564_vm2, %v2096_v8, -inf  ;;  %v590_v10 = vsel %vm589_vm3, %v2096_v8, -inf  ;;  %v615_v50 = vsel %vm614_vm4, %v2096_v8, -inf  ;;  %v639_v14 = vsel %vm564_vm2, %v2096_v8, inf }
 0x53b   :  { %566 = vmax.xlane.f32.xlu0 %v565_v9  ;;  %591 = vmax.xlane.f32.xlu2 %v590_v10 }
 0x53e   :  { %v504_v34 = vpop.permute.xlu2 %503 }
 0x540   :  { %v484_v11 = vpop.permute.xlu1 %483 }
 0x541   :  { %v517_v12 = vsub.f32 %v2004_v54, %v484_v11 }
 0x543   :  { %616 = vmax.xlane.f32.xlu0 %v615_v50 }
 0x546   :  { %v538_v26 = vpop.permute.xlu0 %537  ;;  %v509_v42 = vpop.permute.xlu2 %508 }
 0x549   :  { %v530_v13 = vpop.permute.xlu1 %529 }
 0x54a   :  { %v2107_v2 = vmul.f32 %v530_v13, %v517_v12 }
 0x54b   :  { %640 = vmin.xlane.f32.xlu0 %v639_v14 }
 0x54c   :  { %1647 = vmatmul.msk.f32.gmra.mxu2 %vm346_vm8, %v2107_v2  ;;  %v593_v15 = vsel %vm589_vm3, %v2107_v2, -inf  ;;  %v568_v18 = vsel %vm564_vm2, %v2107_v2, -inf  ;;  %v618_v24 = vsel %vm614_vm4, %v2107_v2, -inf  ;;  %v642_v31 = vsel %vm564_vm2, %v2107_v2, inf }
 0x54d   :  { %594 = vmax.xlane.f32.xlu1 %v593_v15  ;;  %v666_v33 = vsel %vm589_vm3, %v2107_v2, inf }
 0x54e   :  { %v514_v51 = vpop.permute.xlu2 %513 }
 0x552   :  { %v489_v16 = vpop.permute.xlu1 %488 }
 0x553   :  { %v518_v54 = vsub.f32 %v2007_v55, %v489_v16  ;;  %569 = vmax.xlane.f32.xlu0 %v568_v18 }
 0x555   :  { %v2118_v20 = vmul.f32 %v534_v19, %v518_v54 }
 0x557   :  { %1648 = vmatmul.msk.f32.gmra.mxu2 %vm346_vm8, %v2118_v20  ;;  %v571_v22 = vsel %vm564_vm2, %v2118_v20, -inf  ;;  %v645_v29 = vsel %vm564_vm2, %v2118_v20, inf  ;;  %v596_v39 = vsel %vm589_vm3, %v2118_v20, -inf  ;;  %v621_v45 = vsel %vm614_vm4, %v2118_v20, -inf }
 0x558   :  { %572 = vmax.xlane.f32.xlu2 %v571_v22  ;;  %v669_v56 = vsel %vm589_vm3, %v2118_v20, inf }
 0x55a   :  { %v494_v23 = vpop.permute.xlu1 %493 }
 0x55b   :  { %v519_v25 = vsub.f32 %v2014_v59, %v494_v23  ;;  %619 = vmax.xlane.f32.xlu0 %v618_v24 }
 0x55d   :  { %v2127_v55 = vmul.f32 %v538_v26, %v519_v25 }
 0x55f   :  { %1649 = vmatmul.msk.f32.gmra.mxu2 %vm346_vm8, %v2127_v55  ;;  %v599_v27 = vsel %vm589_vm3, %v2127_v55, -inf  ;;  %v648_v59 = vsel %vm564_vm2, %v2127_v55, inf  ;;  %v574_v0 = vsel %vm564_vm2, %v2127_v55, -inf  ;;  %v624_v4 = vsel %vm614_vm4, %v2127_v55, -inf }
 0x560   :  { %600 = vmax.xlane.f32.xlu1 %v599_v27  ;;  %646 = vmin.xlane.f32.xlu2 %v645_v29  ;;  %v672_v7 = vsel %vm589_vm3, %v2127_v55, inf  ;;  %v696_v10 = vsel %vm614_vm4, %v2127_v55, inf }
 0x562   :  { %v499_v30 = vpop.permute.xlu1 %498 }
 0x563   :  { %643 = vmin.xlane.f32.xlu0 %v642_v31  ;;  %v520_v32 = vsub.f32 %v1958_v21, %v499_v30  ;;  %v521_v21 = vsub.f32 %v1985_v17, %v504_v34  ;;  %v522_v17 = vsub.f32 %v1994_v28, %v509_v42  ;;  %v523_v28 = vsub.f32 %v1991_v5, %v514_v51 }
 0x564   :  { %v693_v5 = vsel %vm614_vm4, %v2118_v20, inf }
 0x568   :  { %649 = vmin.xlane.f32.xlu1 %v648_v59 }
 0x56b   :  { %667 = vmin.xlane.f32.xlu0 %v666_v33  ;;  %v542_v35 = vpop.permute.xlu1 %541 }
 0x56c   :  { %v2142_v36 = vmul.f32 %v542_v35, %v520_v32 }
 0x56e   :  { %1650 = vmatmul.msk.f32.gmra.mxu2 %vm346_vm8, %v2142_v36  ;;  %v602_v37 = vsel %vm589_vm3, %v2142_v36, -inf  ;;  %v577_v38 = vsel %vm564_vm2, %v2142_v36, -inf  ;;  %v675_v44 = vsel %vm589_vm3, %v2142_v36, inf  ;;  %v627_v14 = vsel %vm614_vm4, %v2142_v36, -inf }
 0x56f   :  { %603 = vmax.xlane.f32.xlu2 %v602_v37  ;;  %v651_v18 = vsel %vm564_vm2, %v2142_v36, inf  ;;  %v699_v20 = vsel %vm614_vm4, %v2142_v36, inf }
 0x570   :  { %578 = vmax.xlane.f32.xlu1 %v577_v38 }
 0x573   :  { %597 = vmax.xlane.f32.xlu0 %v596_v39  ;;  %v546_v40 = vpop.permute.xlu1 %545 }
 0x574   :  { %v2153_v41 = vmul.f32 %v546_v40, %v521_v21 }
 0x576   :  { %1651 = vmatmul.msk.f32.gmra.mxu2 %vm346_vm8, %v2153_v41  ;;  %v605_v43 = vsel %vm589_vm3, %v2153_v41, -inf  ;;  %v630_v49 = vsel %vm614_vm4, %v2153_v41, -inf  ;;  %v580_v52 = vsel %vm564_vm2, %v2153_v41, -inf  ;;  %v678_v61 = vsel %vm589_vm3, %v2153_v41, inf }
 0x577   :  { %606 = vmax.xlane.f32.xlu2 %v605_v43  ;;  %v702_v63 = vsel %vm614_vm4, %v2153_v41, inf  ;;  %v654_v26 = vsel %vm564_vm2, %v2153_v41, inf }
 0x578   :  { %676 = vmin.xlane.f32.xlu1 %v675_v44 }
 0x57b   :  { %622 = vmax.xlane.f32.xlu0 %v621_v45  ;;  %v550_v46 = vpop.permute.xlu1 %549 }
 0x57c   :  { %v2164_v48 = vmul.f32 %v550_v46, %v522_v17 }
 0x57e   :  { %1652 = vmatmul.msk.f32.gmra.mxu2 %vm346_vm8, %v2164_v48  ;;  %v583_v60 = vsel %vm564_vm2, %v2164_v48, -inf  ;;  %v633_v62 = vsel %vm614_vm4, %v2164_v48, -inf  ;;  %v705_v3 = vsel %vm614_vm4, %v2164_v48, inf  ;;  %v608_v31 = vsel %vm589_vm3, %v2164_v48, -inf }
 0x57f   :  { %631 = vmax.xlane.f32.xlu2 %v630_v49  ;;  %v657_v36 = vsel %vm564_vm2, %v2164_v48, inf  ;;  %v681_v41 = vsel %vm589_vm3, %v2164_v48, inf }
 0x580   :  { %581 = vmax.xlane.f32.xlu1 %v580_v52 }
 0x583   :  { %670 = vmin.xlane.f32.xlu0 %v669_v56  ;;  %v554_v57 = vpop.permute.xlu1 %553 }
 0x584   :  { %v2175_v58 = vmul.f32 %v554_v57, %v523_v28 }
 0x586   :  { %1653 = vmatmul.msk.f32.gmra.mxu2 %vm346_vm8, %v2175_v58  ;;  %v586_v1 = vsel %vm564_vm2, %v2175_v58, -inf  ;;  %v636_v6 = vsel %vm614_vm4, %v2175_v58, -inf  ;;  %v660_v9 = vsel %vm564_vm2, %v2175_v58, inf  ;;  %v708_v13 = vsel %vm614_vm4, %v2175_v58, inf }
 0x587   :  { %584 = vmax.xlane.f32.xlu2 %v583_v60  ;;  %v611_v17 = vsel %vm589_vm3, %v2175_v58, -inf  ;;  %v684_v48 = vsel %vm589_vm3, %v2175_v58, inf  ;;  %vm903_vm8 = vcmask 72704  }
 0x588   :  { %679 = vmin.xlane.f32.xlu1 %v678_v61 }
 0x58b   :  { %694 = vmin.xlane.f32.xlu0 %v693_v5 }
 0x58f   :  { %634 = vmax.xlane.f32.xlu2 %v633_v62 }
 0x590   :  { %703 = vmin.xlane.f32.xlu1 %v702_v63 }
 0x593   :  { %575 = vmax.xlane.f32.xlu0 %v574_v0 }
 0x597   :  { %587 = vmax.xlane.f32.xlu2 %v586_v1 }
 0x598   :  { %706 = vmin.xlane.f32.xlu1 %v705_v3 }
 0x59b   :  { %625 = vmax.xlane.f32.xlu0 %v624_v4 }
 0x5a0   :  { %637 = vmax.xlane.f32.xlu1 %v636_v6 }
 0x5a3   :  { %673 = vmin.xlane.f32.xlu0 %v672_v7 }
 0x5a8   :  { %661 = vmin.xlane.f32.xlu1 %v660_v9 }
 0x5ab   :  { %697 = vmin.xlane.f32.xlu0 %v696_v10  ;;  %v663_v10 = vsel %vm589_vm3, %v2096_v8, inf }
 0x5ae   :  { %v567_v11 = vpop.xlane.xlu0 %566  ;;  %v592_v50 = vpop.xlane.xlu2 %591 }
 0x5af   :  { %v812_v12 = vsel %vm404_vm13, %v567_v11, %v592_v50 }
 0x5b0   :  { %709 = vmin.xlane.f32.xlu1 %v708_v13 }
 0x5b3   :  { %628 = vmax.xlane.f32.xlu0 %v627_v14 }
 0x5b6   :  { %v617_v15 = vpop.xlane.xlu0 %616 }
 0x5b7   :  { %v821_v16 = vsel %vm820_vm5, %v812_v12, %v617_v15  ;;  %v690_v12 = vsel %vm614_vm4, %v2107_v2, inf }
 0x5bb   :  { %652 = vmin.xlane.f32.xlu0 %v651_v18 }
 0x5bd   :  { %v756_v25 = vpop.f32.mrf.mxu2 }
 0x5be   :  { %v641_v54 = vpop.xlane.xlu0 %640 }
 0x5bf   :  { %v2214_v19 = vsel %vm829_vm6, %v821_v16, %v641_v54 }
 0x5c0   :  { %v595_v22 = vpop.xlane.xlu1 %594 }
 0x5c3   :  { %700 = vmin.xlane.f32.xlu0 %v699_v20 }
 0x5c6   :  { %v570_v23 = vpop.xlane.xlu0 %569 }
 0x5c7   :  { %v813_v24 = vsel %vm404_vm13, %v570_v23, %v595_v22 }
 0x5cb   :  { %655 = vmin.xlane.f32.xlu0 %v654_v26  ;;  %v573_v29 = vpop.xlane.xlu2 %572 }
 0x5ce   :  { %v620_v55 = vpop.xlane.xlu0 %619 }
 0x5cf   :  { %v822_v27 = vsel %vm820_vm5, %v813_v24, %v620_v55  ;;  %v2222_v30 = vpop.f32.mrf.mxu2 }
 0x5d3   :  { %609 = vmax.xlane.f32.xlu0 %v608_v31  ;;  %v601_v59 = vpop.xlane.xlu1 %600  ;;  %v647_v34 = vpop.xlane.xlu2 %646 }
 0x5d6   :  { %v644_v32 = vpop.xlane.xlu0 %643 }
 0x5d7   :  { %v831_v33 = vsel %vm829_vm6, %v822_v27, %v644_v32 }
 0x5da   :  { %v762_v35 = vpop.f32.mrf.mxu2 }
 0x5db   :  { %658 = vmin.xlane.f32.xlu0 %v657_v36  ;;  %v650_v37 = vpop.xlane.xlu1 %649 }
 0x5de   :  { %v668_v38 = vpop.xlane.xlu0 %667 }
 0x5df   :  { %v2230_v21 = vsel %vm564_vm2, %v831_v33, %v668_v38 }
 0x5e2   :  { %v765_v39 = vpop.f32.mrf.mxu2  ;;  %v604_v40 = vpop.xlane.xlu2 %603 }
 0x5e3   :  { %682 = vmin.xlane.f32.xlu0 %v681_v41  ;;  %v579_v42 = vpop.xlane.xlu1 %578  ;;  %794 = vrot.lane.b32.xlu1 %v765_v39, %s1891_s16 }
 0x5e4   :  { %v816_v43 = vsel %vm404_vm13, %v579_v42, %v604_v40 }
 0x5e6   :  { %v598_v44 = vpop.xlane.xlu0 %597 }
 0x5e7   :  { %v814_v46 = vsel %vm404_vm13, %v573_v29, %v598_v44  ;;  %v687_v44 = vsel %vm614_vm4, %v2096_v8, inf }
 0x5ea   :  { %v607_v28 = vpop.xlane.xlu2 %606 }
 0x5eb   :  { %v677_v45 = vpop.xlane.xlu1 %676  ;;  %612 = vmax.xlane.f32.xlu0 %v611_v17 }
 0x5ee   :  { %v623_v49 = vpop.xlane.xlu0 %622 }
 0x5ef   :  { %v823_v51 = vsel %vm820_vm5, %v814_v46, %v623_v49 }
 0x5f0   :  { %v832_v61 = vsel %vm829_vm6, %v823_v51, %v647_v34 }
 0x5f1   :  { %v768_v52 = vpop.f32.mrf.mxu2 }
 0x5f2   :  { %796 = vrot.lane.b32.xlu2 %v768_v52, %s1891_s16  ;;  %v632_v24 = vpop.xlane.xlu2 %631 }
 0x5f3   :  { %v582_v56 = vpop.xlane.xlu1 %581  ;;  %685 = vmin.xlane.f32.xlu0 %v684_v48 }
 0x5f4   :  { %v817_v57 = vsel %vm404_vm13, %v582_v56, %v607_v28 }
 0x5f5   :  { %v826_v26 = vsel %vm820_vm5, %v817_v57, %v632_v24 }
 0x5f6   :  { %v671_v60 = vpop.xlane.xlu0 %670 }
 0x5f7   :  { %v840_v5 = vsel %vm564_vm2, %v832_v61, %v671_v60 }
 0x5f9   :  { %v771_v62 = vpop.f32.mrf.mxu2 }
 0x5fa   :  { %798 = vrot.lane.b32.xlu1 %v771_v62, %s1891_s16 }
 0x5fb   :  { %v680_v20 = vpop.xlane.xlu1 %679 }
 0x5fe   :  { %v695_v63 = vpop.xlane.xlu0 %694 }
 0x5ff   :  { %v849_v0 = vsel %vm846_vm7, %v840_v5, %v695_v63 }
 0x601   :  { %v774_v18 = vpop.f32.mrf.mxu2 }
 0x603   :  { %v704_v27 = vpop.xlane.xlu1 %703 }
 0x606   :  { %v576_v1 = vpop.xlane.xlu0 %575 }
 0x607   :  { %v815_v58 = vsel %vm404_vm13, %v576_v1, %v601_v59  ;;  %792 = vrot.lane.b32.xlu0 %v762_v35, %s1891_s16  ;;  %v585_v59 = vpop.xlane.xlu2 %584 }
 0x60e   :  { %v626_v3 = vpop.xlane.xlu0 %625 }
 0x60f   :  { %v824_v4 = vsel %vm820_vm5, %v815_v58, %v626_v3  ;;  %788 = vrot.lane.b32.xlu0 %v756_v25, %s1891_s16  ;;  %v777_v25 = vpop.f32.mrf.mxu2  ;;  %v635_v34 = vpop.xlane.xlu2 %634 }
 0x610   :  { %v833_v6 = vsel %vm829_vm6, %v824_v4, %v650_v37  ;;  %v707_v37 = vpop.xlane.xlu1 %706 }
 0x616   :  { %v674_v7 = vpop.xlane.xlu0 %673 }
 0x617   :  { %v841_v9 = vsel %vm564_vm2, %v833_v6, %v674_v7  ;;  %v588_v57 = vpop.xlane.xlu2 %587 }
 0x618   :  { %v638_v42 = vpop.xlane.xlu1 %637 }
 0x61b   :  { %664 = vmin.xlane.f32.xlu2 %v663_v10 }
 0x61e   :  { %v698_v11 = vpop.xlane.xlu0 %697 }
 0x61f   :  { %v850_v50 = vsel %vm846_vm7, %v841_v9, %v698_v11 }
 0x624   :  { %691 = vmin.xlane.f32.xlu1 %v690_v12 }
 0x626   :  { %v629_v13 = vpop.xlane.xlu0 %628 }
 0x627   :  { %v825_v14 = vsel %vm820_vm5, %v816_v43, %v629_v13  ;;  %v662_v43 = vpop.xlane.xlu1 %661 }
 0x62e   :  { %v653_v15 = vpop.xlane.xlu0 %652 }
 0x62f   :  { %v834_v16 = vsel %vm829_vm6, %v825_v14, %v653_v15 }
 0x630   :  { %v842_v54 = vsel %vm564_vm2, %v834_v16, %v677_v45  ;;  %v710_v45 = vpop.xlane.xlu1 %709 }
 0x633   :  { %800 = vrot.lane.b32.xlu2 %v774_v18, %s1891_s16 }
 0x636   :  { %v701_v22 = vpop.xlane.xlu0 %700 }
 0x637   :  { %v851_v23 = vsel %vm846_vm7, %v842_v54, %v701_v22 }
 0x63b   :  { %802 = vrot.lane.b32.xlu2 %v777_v25, %s1891_s16 }
 0x63e   :  { %v656_v2 = vpop.xlane.xlu0 %655 }
 0x63f   :  { %v835_v55 = vsel %vm829_vm6, %v826_v26, %v656_v2 }
 0x640   :  { %v843_v29 = vsel %vm564_vm2, %v835_v55, %v680_v20 }
 0x641   :  { %v852_v31 = vsel %vm846_vm7, %v843_v29, %v704_v27 }
 0x646   :  { %v610_v32 = vpop.xlane.xlu0 %609 }
 0x647   :  { %v818_v33 = vsel %vm404_vm13, %v585_v59, %v610_v32 }
 0x648   :  { %v827_v36 = vsel %vm820_vm5, %v818_v33, %v635_v34 }
 0x64c   :  { %v797_v60 = vpop.permute.xlu2 %796 }
 0x64e   :  { %v659_v35 = vpop.xlane.xlu0 %658 }
 0x64f   :  { %v836_v38 = vsel %vm829_vm6, %v827_v36, %v659_v35 }
 0x655   :  { %v795_v49 = vpop.permute.xlu1 %794 }
 0x656   :  { %v683_v39 = vpop.xlane.xlu0 %682  ;;  %v2277_v51 = vsel %vm406_vm0, %v850_v50, %v795_v49  ;;  %v2311_v50 = vsel %vm406_vm0, %v851_v23, %v797_v60  ;;  %v45_v49 = vld [vmem:[%s2830_s1 + $0x98] sm:$0xff] }
 0x657   :  { %v844_v40 = vsel %vm564_vm2, %v836_v38, %v683_v39  ;;  %v866_v28 = vmul.f32 %v2277_v51, %v2277_v51  ;;  %v867_v13 = vmul.f32 %v2311_v50, %v2311_v50 }
 0x658   :  { %v853_v41 = vsel %vm846_vm7, %v844_v40, %v707_v37 }
 0x65e   :  { %v613_v17 = vpop.xlane.xlu0 %612 }
 0x65f   :  { %v819_v62 = vsel %vm404_vm13, %v588_v57, %v613_v17  ;;  %v43_v17 = vld [vmem:[%s2830_s1 + $0x88] sm:$0x1] }
 0x660   :  { %v47_v57 = vld [vmem:[%s2830_s1 + $0xa8] sm:$0x3f] }
 0x664   :  { %688 = vmin.xlane.f32.xlu2 %v687_v44 }
 0x666   :  { %v686_v46 = vpop.xlane.xlu0 %685 }
 0x66c   :  { %v799_v7 = vpop.permute.xlu1 %798 }
 0x66d   :  { %v2307_v11 = vsel %vm406_vm0, %v852_v31, %v799_v7 }
 0x66e   :  { %v868_v12 = vmul.f32 %v2307_v11, %v2307_v11 }
 0x670   :  { %v1781_v14 = vpack.i.bf16 %v867_v13, %v868_v12 }
 0x679   :  { %v793_v52 = vpop.permute.xlu0 %792 }
 0x67a   :  { %v2280_v48 = vsel %vm406_vm0, %v849_v0, %v793_v52  ;;  %v828_v0 = vsel %vm820_vm5, %v819_v62, %v638_v42  ;;  %v44_v52 = vld [vmem:[%s2830_s1 + $0x90] sm:$0xff] }
 0x67b   :  { %v865_v56 = vmul.f32 %v2280_v48, %v2280_v48  ;;  %v837_v1 = vsel %vm829_vm6, %v828_v0, %v662_v43 }
 0x67c   :  { %790 = vrot.lane.b32.xlu2 %v2222_v30, %s1891_s16  ;;  %v845_v58 = vsel %vm564_vm2, %v837_v1, %v686_v46  ;;  %v46_v46 = vld [vmem:[%s2830_s1 + $0xa0] sm:$0x3] }
 0x67d   :  { %v1786_v8 = vpack.i.bf16 %v865_v56, %v866_v28  ;;  %v854_v3 = vsel %vm846_vm7, %v845_v58, %v710_v45 }
 0x67f   :  { %1787 = vrot.lane.b32.xlu1 %v1786_v8, %s1892_s17 }
 0x681   :  { %v789_v54 = vpop.permute.xlu0 %788 }
 0x68e   :  { %v665_v61 = vpop.xlane.xlu2 %664 }
 0x68f   :  { %v838_v5 = vsel %vm564_vm2, %v2214_v19, %v665_v61  ;;  %vm1620_vm2 = vcmask 1024  }
 0x696   :  { %v801_v63 = vpop.permute.xlu2 %800 }
 0x697   :  { %v2296_v30 = vsel %vm406_vm0, %v853_v41, %v801_v63  ;;  %v692_v18 = vpop.xlane.xlu1 %691 }
 0x698   :  { %v869_v19 = vmul.f32 %v2296_v30, %v2296_v30  ;;  %v848_v22 = vsel %vm846_vm7, %v2230_v21, %v692_v18 }
 0x69e   :  { %v803_v4 = vpop.permute.xlu2 %802 }
 0x69f   :  { %v2300_v6 = vsel %vm406_vm0, %v854_v3, %v803_v4 }
 0x6a0   :  { %v870_v9 = vmul.f32 %v2300_v6, %v2300_v6 }
 0x6a2   :  { %v1776_v10 = vpack.i.bf16 %v869_v19, %v870_v9 }
 0x6a4   :  { %1777 = vrot.lane.b32.xlu0 %v1776_v10, %s1892_s17 }
 0x6ac   :  { %1782 = vrot.lane.b32.xlu0 %v1781_v14, %s1892_s17 }
 0x6d7   :  { %v689_v15 = vpop.xlane.xlu2 %688 }
 0x6d8   :  { %v847_v16 = vsel %vm846_vm7, %v838_v5, %v689_v15 }
 0x6d9   :  { %v2320_v20 = vsel %vm406_vm0, %v847_v16, %v789_v54  ;;  %v1894_v54 = vmov 2  }
 0x6da   :  { %v863_v2 = vmul.f32 %v2320_v20, %v2320_v20 }
 0x6df   :  { %v791_v23 = vpop.permute.xlu2 %790 }
 0x6e0   :  { %v2325_v24 = vsel %vm406_vm0, %v848_v22, %v791_v23 }
 0x6e1   :  { %v864_v25 = vmul.f32 %v2325_v24, %v2325_v24 }
 0x6e3   :  { %v1791_v26 = vpack.i.bf16 %v863_v2, %v864_v25 }
 0x6e5   :  { %1792 = vrot.lane.b32.xlu2 %v1791_v26, %s1892_s17 }
 0x6f1   :  { %v1788_v59 = vpop.permute.xlu1 %1787 }
 0x6f2   :  { %v1789_v35 = vunpack.i.l.bf16 %v1788_v59  ;;  %v1790_v37 = vunpack.i.h.bf16 %v1788_v59 }
 0x6f4   :  { %v907_v39 = vsel %vm903_vm8, %v2277_v51, %v1789_v35  ;;  %v906_v40 = vsel %vm903_vm8, %v2280_v48, %v1790_v37 }
 0x716   :  { %v1778_v55 = vpop.permute.xlu0 %1777 }
 0x717   :  { %v1780_v27 = vunpack.i.h.bf16 %v1778_v55  ;;  %v1779_v29 = vunpack.i.l.bf16 %v1778_v55  ;;  %v1897_v55 = vmov 5  }
 0x719   :  { %v911_v21 = vsel %vm903_vm8, %v2300_v6, %v1779_v29  ;;  %v910_v31 = vsel %vm903_vm8, %v2296_v30, %v1780_v27  ;;  %v1899_v27 = vmov 6  }
 0x71a   :  { %923 = vmatpush.msra.mxu3 %v911_v21 }
 0x71c   :  { %924 = vmatpush.msra.mxu3 %v910_v31 }
 0x71e   :  { %v1783_v32 = vpop.permute.xlu0 %1782 }
 0x71f   :  { %v1785_v33 = vunpack.i.h.bf16 %v1783_v32  ;;  %v1784_v34 = vunpack.i.l.bf16 %v1783_v32 }
 0x721   :  { %v909_v36 = vsel %vm903_vm8, %v2307_v11, %v1784_v34  ;;  %v908_v38 = vsel %vm903_vm8, %v2311_v50, %v1785_v33  ;;  %v1665_v33 = vld [vmem:[%s2832_s2 + $0x70] sm:$0xff] }
 0x722   :  { %925 = vmatpush.msra.mxu3 %v909_v36 }
 0x724   :  { %926 = vmatpush.msra.mxu3 %v908_v38 }
 0x726   :  { %927 = vmatpush.msra.mxu3 %v907_v39  ;;  %v1036_v39 = vld [vmem:[%s2832_s2 + $0x38] sm:$0xff] }
 0x728   :  { %928 = vmatpush.msra.mxu3 %v906_v40 }
 0x73f   :  { %v1793_v41 = vpop.permute.xlu2 %1792 }
 0x740   :  { %v1795_v42 = vunpack.i.h.bf16 %v1793_v41  ;;  %v1794_v43 = vunpack.i.l.bf16 %v1793_v41  ;;  %v1666_v41 = vld [vmem:[%s2832_s2 + $0x78] sm:$0xff] }
 0x742   :  { %v905_v44 = vsel %vm903_vm8, %v2325_v24, %v1794_v43  ;;  %v904_v45 = vsel %vm903_vm8, %v2320_v20, %v1795_v42  ;;  %v1664_v42 = vld [vmem:[%s2832_s2 + $0x68] sm:$0xff] }
 0x743   :  { %929 = vmatpush.msra.mxu3 %v905_v44  ;;  %v1674_v44 = vld [vmem:[%s2832_s2 + $0xb8] sm:$0xff] }
 0x745   :  { %930 = vmatpush.msra.mxu3 %v904_v45  ;;  %v1672_v45 = vld [vmem:[%s2832_s2 + $0xa8] sm:$0xff] }
 0x746   :  { %1654 = vmatmul.msk.f32.vlgmr.msra.gmra.mxu3 %vm355_vm9, %v43_v17 }
 0x747   :  { %1655 = vmatpush.msk.msrb.mxu3 %vm939_vm10, %v46_v46 }
 0x749   :  { %957 = vmatpush.msrb.mxu3 %v45_v49  ;;  %v1682_v49 = vld [vmem:[%s2832_s2 + $0xf8] sm:$0xff] }
 0x74b   :  { %958 = vmatpush.msrb.mxu3 %v44_v52 }
 0x74d   :  { %1657 = vmatpush.msk.msra.mxu3 %vm431_vm15, %v47_v57 }
 0x7c9   :  { %v932_v28 = vpop.f32.mrf.mxu3 }
 0x7ca   :  { %1656 = vmatmul.msk.f32.vlgmr.msrb.gmra.mxu3 %vm935_vm11, %v932_v28 }
 0x84d   :  { %v960_v56 = vpop.f32.mrf.mxu3 }
 0x84e   :  { %v963_v8 = vmul.f32 %v960_v56, %v960_v56 }
 0x850   :  { %965 = vrot.lane.b32.xlu0 %v963_v8, %s1880_s27  ;;  %s1893_s27 = smov 119  }
 0x8c2   :  { %v966_v60 = vpop.permute.xlu0 %965 }
 0x8c3   :  { %v968_v61 = vsub.f32 %v960_v56, %v966_v60 }
 0x8c5   :  { %v969_v5 = vmax.f32 %v968_v61, 0.0 }
 0x8c7   :  { %v970_v62 = vadd.f32 1e-05, %v969_v5 }
 0x8c9   :  { %1874 = vrsqrt.f32 %v970_v62  ;;  %vm977_vm13 = vweird.f32 %v970_v62 }
 0x8cf   :  { %v1875_v63 = vpop.eup %1874 }
 0x8d0   :  { %v972_v0 = vmul.f32 %v1875_v63, %v970_v62  ;;  %vm978_vm12 = vweird.f32 %v1875_v63 }
 0x8d1   :  { %vm979_vm14 = vmor %vm977_vm13, %vm978_vm12 }
 0x8d2   :  { %v973_v1 = vmul.f32 %v1875_v63, %v972_v0 }
 0x8d4   :  { %v974_v58 = vmul.f32 0.5, %v973_v1 }
 0x8d6   :  { %v975_v3 = vsub.f32 1.5, %v974_v58  ;;  %v1673_v58 = vld [vmem:[%s2832_s2 + $0xb0] sm:$0xff] }
 0x8d8   :  { %v976_v4 = vmul.f32 %v1875_v63, %v975_v3  ;;  %v1690_v3 = vld [vmem:[%s2832_s2 + $0x138] sm:$0xff] }
 0x8da   :  { %v980_v7 = vsel %vm979_vm14, %v1875_v63, %v976_v4 }
 0x8db   :  { %v981_v19 = vsel %vm829_vm6, %v960_v56, %v980_v7  ;;  %v1900_v56 = vmov 8  }
 0x8dc   :  { %1658 = vmatmul.msk.f32.vlgmr.msra.gmra.mxu3 %vm406_vm0, %v981_v19 }
 0x95f   :  { %v1005_v9 = vpop.f32.mrf.mxu3 }
 0x960   :  { %v2368_v10 = vperm.slane %v1005_v9, 0 }
 0x962   :  { %1018 = vrot.lane.b32.xlu2 %v2368_v10, %s1893_s27  ;;  %v1015_v13 = vsub.f32 %v2296_v30, %v2368_v10  ;;  %v1016_v14 = vsub.f32 %v2300_v6, %v2368_v10  ;;  %v1014_v18 = vsub.f32 %v2307_v11, %v2368_v10  ;;  %v1013_v6 = vsub.f32 %v2311_v50, %v2368_v10 }
 0x963   :  { %v1012_v11 = vsub.f32 %v2277_v51, %v2368_v10  ;;  %v1895_v50 = vmov 3   ;;  %v1896_v51 = vmov 4   ;;  %v1010_v25 = vsub.f32 %v2325_v24, %v2368_v10 }
 0x964   :  { %v1011_v26 = vsub.f32 %v2280_v48, %v2368_v10  ;;  %v1898_v48 = vmov 7   ;;  %v1009_v31 = vsub.f32 %v2320_v20, %v2368_v10  ;;  %v1035_v20 = vld [vmem:[%s2832_s2 + $0x30] sm:$0xff] }
 0x9bc   :  { %v2371_v12 = vpop.permute.xlu2 %1018 }
 0x9bd   :  { %v2378_v15 = vmul.f32 %v2371_v12, %v1015_v13  ;;  %v2381_v16 = vmul.f32 %v2371_v12, %v1016_v14  ;;  %v2389_v30 = vmul.f32 %v2371_v12, %v1014_v18  ;;  %v2398_v22 = vmul.f32 %v2371_v12, %v1013_v6  ;;  %v1033_v13 = vld [vmem:[%s2832_s2 + $0x20] sm:$0xff] }
 0x9be   :  { %v2408_v23 = vmul.f32 %v2371_v12, %v1012_v11  ;;  %v2430_v2 = vmul.f32 %v2371_v12, %v1010_v25  ;;  %v2442_v24 = vmul.f32 %v2371_v12, %v1011_v26  ;;  %v2476_v59 = vmul.f32 %v2371_v12, %v1009_v31  ;;  %v1663_v18 = vld [vmem:[%s2832_s2 + $0x60] sm:$0xff] }
 0x9bf   :  { %1123 = vperm.xlu2 %1797, %v2381_v16   ;;  %1074 = vperm.xlu0 %1796, %v2381_v16   ;;  %v1671_v6 = vld [vmem:[%s2832_s2 + $0xa0] sm:$0xff] }
 0x9c0   :  { %1069 = vperm.xlu1 %1798, %v2378_v15  }
 0x9c7   :  { %1799 = vset.pattern.permute.xlu0 %v1894_v54  ;;  %1119 = vperm.xlu2 %1797, %v2378_v15  }
 0x9c8   :  { %1064 = vperm.xlu1 %1798, %v2389_v30   ;;  %1180 = vperm.xlu0 %1799, %v2381_v16  }
 0x9cf   :  { %1115 = vperm.xlu2 %1797, %v2389_v30  }
 0x9d0   :  { %1800 = vset.pattern.permute.xlu1 %v1894_v54  ;;  %1802 = vset.pattern.permute.xlu0 %v1889_v47 }
 0x9d1   :  { %1176 = vperm.xlu1 %1800, %v2378_v15   ;;  %1059 = vperm.xlu0 %1802, %v2398_v22  }
 0x9d7   :  { %1801 = vset.pattern.permute.xlu2 %v1895_v50 }
 0x9d8   :  { %1237 = vperm.xlu2 %1801, %v2381_v16  }
 0x9d9   :  { %1803 = vset.pattern.permute.xlu1 %v1890_v53  ;;  %1054 = vperm.xlu0 %1802, %v2408_v23  }
 0x9da   :  { %1111 = vperm.xlu1 %1803, %v2398_v22  }
 0x9e0   :  { %1804 = vset.pattern.permute.xlu2 %v1894_v54 }
 0x9e1   :  { %1172 = vperm.xlu2 %1804, %v2389_v30   ;;  %1809 = vset.pattern.permute.xlu0 %v1895_v50 }
 0x9e2   :  { %1805 = vset.pattern.permute.xlu1 %v1895_v50  ;;  %1229 = vperm.xlu0 %1809, %v2389_v30  }
 0x9e3   :  { %1233 = vperm.xlu1 %1805, %v2378_v15  }
 0x9e9   :  { %1806 = vset.pattern.permute.xlu2 %v1896_v51 }
 0x9ea   :  { %1294 = vperm.xlu2 %1806, %v2381_v16   ;;  %1814 = vset.pattern.permute.xlu0 %v1894_v54 }
 0x9eb   :  { %1807 = vset.pattern.permute.xlu1 %v1890_v53  ;;  %1164 = vperm.xlu0 %1814, %v2408_v23  }
 0x9ec   :  { %1107 = vperm.xlu1 %1807, %v2408_v23  }
 0x9f2   :  { %1808 = vset.pattern.permute.xlu2 %v1894_v54 }
 0x9f3   :  { %1168 = vperm.xlu2 %1808, %v2398_v22   ;;  %1819 = vset.pattern.permute.xlu0 %v1889_v47 }
 0x9f4   :  { %1810 = vset.pattern.permute.xlu1 %v1896_v51  ;;  %1044 = vperm.xlu0 %1819, %v2430_v2  }
 0x9f5   :  { %1290 = vperm.xlu1 %1810, %v2378_v15  }
 0x9fb   :  { %1811 = vset.pattern.permute.xlu2 %v1897_v55 }
 0x9fc   :  { %1351 = vperm.xlu2 %1811, %v2381_v16   ;;  %1824 = vset.pattern.permute.xlu0 %v1897_v55 }
 0x9fd   :  { %1812 = vset.pattern.permute.xlu1 %v1889_v47  ;;  %1343 = vperm.xlu0 %1824, %v2389_v30  }
 0x9fe   :  { %1049 = vperm.xlu1 %1812, %v2442_v24  }
 0xa04   :  { %1813 = vset.pattern.permute.xlu2 %v1890_v53 }
 0xa05   :  { %1103 = vperm.xlu2 %1813, %v2442_v24   ;;  %1829 = vset.pattern.permute.xlu0 %v1894_v54 }
 0xa06   :  { %1815 = vset.pattern.permute.xlu1 %v1895_v50  ;;  %1156 = vperm.xlu0 %1829, %v2430_v2  }
 0xa07   :  { %1225 = vperm.xlu1 %1815, %v2398_v22  }
 0xa0d   :  { %1816 = vset.pattern.permute.xlu2 %v1896_v51 }
 0xa0e   :  { %1286 = vperm.xlu2 %1816, %v2389_v30   ;;  %1834 = vset.pattern.permute.xlu0 %v1898_v48 }
 0xa0f   :  { %1817 = vset.pattern.permute.xlu1 %v1897_v55  ;;  %1461 = vperm.xlu0 %1834, %v2378_v15  }
 0xa10   :  { %1347 = vperm.xlu1 %1817, %v2378_v15  }
 0xa16   :  { %1818 = vset.pattern.permute.xlu2 %v1899_v27 }
 0xa17   :  { %1408 = vperm.xlu2 %1818, %v2381_v16   ;;  %1839 = vset.pattern.permute.xlu0 %v1897_v55 }
 0xa18   :  { %1820 = vset.pattern.permute.xlu1 %v1890_v53  ;;  %1335 = vperm.xlu0 %1839, %v2408_v23  }
 0xa19   :  { %1099 = vperm.xlu1 %1820, %v2430_v2   ;;  %v1124_v29 = vpop.permute.xlu2 %1123 }
 0xa1a   :  { %v1133_v17 = vmul.f32 %v1666_v41, %v1124_v29 }
 0xa1f   :  { %1821 = vset.pattern.permute.xlu2 %v1894_v54 }
 0xa20   :  { %1160 = vperm.xlu2 %1821, %v2442_v24   ;;  %1844 = vset.pattern.permute.xlu0 %v1896_v51 }
 0xa21   :  { %1822 = vset.pattern.permute.xlu1 %v1895_v50  ;;  %v1120_v21 = vpop.permute.xlu2 %1119  ;;  %1270 = vperm.xlu0 %1844, %v2430_v2  }
 0xa22   :  { %1221 = vperm.xlu1 %1822, %v2408_v23   ;;  %v1132_v37 = vmul.f32 %v1665_v33, %v1120_v21  ;;  %v1681_v33 = vld [vmem:[%s2832_s2 + $0xf0] sm:$0xff] }
 0xa28   :  { %1823 = vset.pattern.permute.xlu2 %v1896_v51 }
 0xa29   :  { %v1116_v32 = vpop.permute.xlu2 %1115  ;;  %1282 = vperm.xlu2 %1823, %v2398_v22   ;;  %1266 = vperm.xlu0 %1844, %v2476_v59  }
 0xa2a   :  { %1825 = vset.pattern.permute.xlu1 %v1899_v27  ;;  %v1131_v46 = vmul.f32 %v1664_v42, %v1116_v32 }
 0xa2b   :  { %1404 = vperm.xlu1 %1825, %v2378_v15  }
 0xa31   :  { %v1075_v34 = vpop.permute.xlu0 %1074  ;;  %1826 = vset.pattern.permute.xlu2 %v1898_v48  ;;  %1851 = vset.pattern.permute.xlu0 %v1898_v48 }
 0xa32   :  { %v1070_v35 = vpop.permute.xlu1 %1069  ;;  %v1238_v36 = vpop.permute.xlu2 %1237  ;;  %1465 = vperm.xlu2 %1826, %v2381_v16   ;;  %1449 = vperm.xlu0 %1851, %v2408_v23   ;;  %v1084_v43 = vmul.f32 %v1075_v34, %v1036_v39 }
 0xa33   :  { %v1083_v38 = vmul.f32 %v1070_v35, %v1035_v20  ;;  %1827 = vset.pattern.permute.xlu1 %v1889_v47  ;;  %v1034_v47 = vld [vmem:[%s2832_s2 + $0x28] sm:$0xff]  ;;  %v1247_v62 = vmul.f32 %v1682_v49, %v1238_v36  ;;  %v1698_v20 = vld [vmem:[%s2832_s2 + $0x178] sm:$0xff] }
 0xa34   :  { %1039 = vperm.xlu1 %1827, %v2476_v59   ;;  %v1141_v8 = vadd.f32 %v1133_v17, %v1084_v43  ;;  %v1680_v17 = vld [vmem:[%s2832_s2 + $0xe8] sm:$0xff] }
 0xa35   :  { %v1140_v40 = vadd.f32 %v1132_v37, %v1083_v38  ;;  %v1688_v49 = vld [vmem:[%s2832_s2 + $0x128] sm:$0xff] }
 0xa3a   :  { %v1065_v52 = vpop.permute.xlu1 %1064  ;;  %v1181_v28 = vpop.permute.xlu0 %1180  ;;  %1828 = vset.pattern.permute.xlu2 %v1890_v53  ;;  %1856 = vset.pattern.permute.xlu0 %v1900_v56 }
 0xa3b   :  { %v1082_v57 = vmul.f32 %v1065_v52, %v1034_v47  ;;  %v1190_v60 = vmul.f32 %v1674_v44, %v1181_v28  ;;  %v1173_v61 = vpop.permute.xlu2 %1172  ;;  %1506 = vperm.xlu0 %1856, %v2408_v23   ;;  %1095 = vperm.xlu2 %1828, %v2476_v59  }
 0xa3c   :  { %v1188_v5 = vmul.f32 %v1672_v45, %v1173_v61  ;;  %1830 = vset.pattern.permute.xlu1 %v1895_v50 }
 0xa3d   :  { %v1139_v63 = vadd.f32 %v1131_v46, %v1082_v57  ;;  %v1198_v0 = vadd.f32 %v1190_v60, %v1141_v8  ;;  %1217 = vperm.xlu1 %1830, %v2442_v24  }
 0xa3f   :  { %v2522_v53 = vadd.f32 %v1188_v5, %v1139_v63  ;;  %v1255_v1 = vadd.f32 %v1247_v62, %v1198_v0  ;;  %v1661_v62 = vld [vmem:[%s2832_s2 + $0x50] sm:$0xff] }
 0xa40   :  { %v1031_v63 = vld [vmem:[%s2832_s2 + $0x10] sm:$0xff] }
 0xa43   :  { %v1177_v4 = vpop.permute.xlu1 %1176  ;;  %1498 = vperm.xlu0 %1856, %v2430_v2   ;;  %1831 = vset.pattern.permute.xlu2 %v1896_v51  ;;  %v1060_v14 = vpop.permute.xlu0 %1059 }
 0xa44   :  { %v1189_v7 = vmul.f32 %v1673_v58, %v1177_v4  ;;  %v1295_v19 = vpop.permute.xlu2 %1294  ;;  %1278 = vperm.xlu2 %1831, %v2408_v23   ;;  %v1081_v25 = vmul.f32 %v1060_v14, %v1033_v13  ;;  %v1669_v4 = vld [vmem:[%s2832_s2 + $0x90] sm:$0xff] }
 0xa45   :  { %v1304_v9 = vmul.f32 %v1690_v3, %v1295_v19  ;;  %1832 = vset.pattern.permute.xlu1 %v1897_v55  ;;  %v1679_v3 = vld [vmem:[%s2832_s2 + $0xe0] sm:$0xff]  ;;  %v1697_v14 = vld [vmem:[%s2832_s2 + $0x170] sm:$0xff] }
 0xa46   :  { %v1197_v10 = vadd.f32 %v1189_v7, %v1140_v40  ;;  %1339 = vperm.xlu1 %1832, %v2398_v22   ;;  %v1032_v40 = vld [vmem:[%s2832_s2 + $0x18] sm:$0xff] }
 0xa47   :  { %v1312_v12 = vadd.f32 %v1304_v9, %v1255_v1 }
 0xa4c   :  { %v1112_v11 = vpop.permute.xlu1 %1111  ;;  %1833 = vset.pattern.permute.xlu2 %v1899_v27 }
 0xa4d   :  { %v1130_v26 = vmul.f32 %v1663_v18, %v1112_v11  ;;  %v1169_v29 = vpop.permute.xlu2 %1168  ;;  %1400 = vperm.xlu2 %1833, %v2389_v30   ;;  %v1687_v18 = vld [vmem:[%s2832_s2 + $0x120] sm:$0xff] }
 0xa4e   :  { %v1187_v21 = vmul.f32 %v1671_v6, %v1169_v29  ;;  %1835 = vset.pattern.permute.xlu1 %v1900_v56 }
 0xa4f   :  { %v1138_v31 = vadd.f32 %v1130_v26, %v1081_v25  ;;  %1522 = vperm.xlu1 %1835, %v2381_v16   ;;  %v1055_v16 = vpop.permute.xlu0 %1054 }
 0xa50   :  { %v1080_v42 = vmul.f32 %v1055_v16, %v1032_v40 }
 0xa51   :  { %v1195_v32 = vadd.f32 %v1187_v21, %v1138_v31  ;;  %v1030_v21 = vld [vmem:[%s2832_s2 + $0x8] sm:$0xff] }
 0xa55   :  { %v1234_v34 = vpop.permute.xlu1 %1233  ;;  %1836 = vset.pattern.permute.xlu2 %v1894_v54  ;;  %v1662_v54 = vld [vmem:[%s2832_s2 + $0x58] sm:$0xff] }
 0xa56   :  { %v1246_v35 = vmul.f32 %v1681_v33, %v1234_v34  ;;  %v1352_v36 = vpop.permute.xlu2 %1351  ;;  %1152 = vperm.xlu2 %1836, %v2476_v59  }
 0xa57   :  { %v1361_v37 = vmul.f32 %v1698_v20, %v1352_v36  ;;  %1837 = vset.pattern.permute.xlu1 %v1895_v50  ;;  %v1230_v45 = vpop.permute.xlu0 %1229  ;;  %v1670_v36 = vld [vmem:[%s2832_s2 + $0x98] sm:$0xff] }
 0xa58   :  { %v1254_v38 = vadd.f32 %v1246_v35, %v1197_v10  ;;  %1213 = vperm.xlu1 %1837, %v2430_v2   ;;  %v1245_v46 = vmul.f32 %v1680_v17, %v1230_v45  ;;  %v1029_v17 = vld [vmem:[%s2832_s2] sm:$0xff] }
 0xa59   :  { %v2558_v39 = vadd.f32 %v1361_v37, %v1312_v12  ;;  %v1678_v37 = vld [vmem:[%s2832_s2 + $0xd8] sm:$0xff] }
 0xa5a   :  { %v1253_v57 = vadd.f32 %v1245_v46, %v2522_v53 }
 0xa5e   :  { %v1108_v41 = vpop.permute.xlu1 %1107  ;;  %1838 = vset.pattern.permute.xlu2 %v1896_v51  ;;  %v1689_v51 = vld [vmem:[%s2832_s2 + $0x130] sm:$0xff] }
 0xa5f   :  { %v1129_v43 = vmul.f32 %v1662_v54, %v1108_v41  ;;  %v1104_v47 = vpop.permute.xlu2 %1103  ;;  %1274 = vperm.xlu2 %1838, %v2442_v24   ;;  %v1165_v13 = vpop.permute.xlu0 %1164 }
 0xa60   :  { %1840 = vset.pattern.permute.xlu1 %v1899_v27  ;;  %v1128_v53 = vmul.f32 %v1661_v62, %v1104_v47  ;;  %v1186_v16 = vmul.f32 %v1670_v36, %v1165_v13  ;;  %v1685_v62 = vld [vmem:[%s2832_s2 + $0x110] sm:$0xff] }
 0xa61   :  { %v2569_v44 = vadd.f32 %v1129_v43, %v1080_v42  ;;  %1396 = vperm.xlu1 %1840, %v2398_v22   ;;  %v1686_v42 = vld [vmem:[%s2832_s2 + $0x118] sm:$0xff]  ;;  %v1705_v36 = vld [vmem:[%s2832_s2 + $0x1b0] sm:$0xff] }
 0xa63   :  { %v1194_v40 = vadd.f32 %v1186_v16, %v2569_v44 }
 0xa67   :  { %v1291_v52 = vpop.permute.xlu1 %1290  ;;  %1841 = vset.pattern.permute.xlu2 %v1898_v48  ;;  %v1045_v31 = vpop.permute.xlu0 %1044 }
 0xa68   :  { %v1303_v28 = vmul.f32 %v1689_v51, %v1291_v52  ;;  %v1287_v8 = vpop.permute.xlu2 %1286  ;;  %1457 = vperm.xlu2 %1841, %v2389_v30   ;;  %v1677_v52 = vld [vmem:[%s2832_s2 + $0xd0] sm:$0xff] }
 0xa69   :  { %v1302_v60 = vmul.f32 %v1688_v49, %v1287_v8  ;;  %1842 = vset.pattern.permute.xlu1 %v1900_v56 }
 0xa6a   :  { %v1311_v61 = vadd.f32 %v1303_v28, %v1254_v38  ;;  %1518 = vperm.xlu1 %1842, %v2378_v15   ;;  %v1667_v28 = vld [vmem:[%s2832_s2 + $0x80] sm:$0xff] }
 0xa6b   :  { %v2586_v5 = vadd.f32 %v1302_v60, %v1253_v57 }
 0xa70   :  { %v1050_v0 = vpop.permute.xlu1 %1049  ;;  %1843 = vset.pattern.permute.xlu2 %v1895_v50 }
 0xa71   :  { %v1079_v1 = vmul.f32 %v1050_v0, %v1031_v63  ;;  %v2595_v58 = vpop.permute.xlu2 %1408  ;;  %1209 = vperm.xlu2 %1843, %v2476_v59   ;;  %v1344_v0 = vpop.permute.xlu0 %1343 }
 0xa72   :  { %1845 = vset.pattern.permute.xlu1 %v1897_v55 }
 0xa73   :  { %v1136_v15 = vadd.f32 %v1128_v53, %v1079_v1  ;;  %1331 = vperm.xlu1 %1845, %v2442_v24   ;;  %v1706_v53 = vld [vmem:[%s2832_s2 + $0x1b8] sm:$0xff] }
 0xa79   :  { %v1226_v50 = vpop.permute.xlu1 %1225  ;;  %1846 = vset.pattern.permute.xlu2 %v1899_v27 }
 0xa7a   :  { %v1244_v7 = vmul.f32 %v1679_v3, %v1226_v50  ;;  %v1161_v19 = vpop.permute.xlu2 %1160  ;;  %1392 = vperm.xlu2 %1846, %v2408_v23   ;;  %v1714_v3 = vld [vmem:[%s2832_s2 + $0x1f8] sm:$0xff]  ;;  %v1418_v50 = vmul.f32 %v1706_v53, %v2595_v58  ;;  %v1676_v58 = vld [vmem:[%s2832_s2 + $0xc8] sm:$0xff] }
 0xa7b   :  { %v1185_v9 = vmul.f32 %v1669_v4, %v1161_v19  ;;  %1847 = vset.pattern.permute.xlu1 %v1898_v48 }
 0xa7c   :  { %v1252_v10 = vadd.f32 %v1244_v7, %v1195_v32  ;;  %1453 = vperm.xlu1 %1847, %v2398_v22   ;;  %v1660_v32 = vld [vmem:[%s2832_s2 + $0x48] sm:$0xff] }
 0xa7d   :  { %v2610_v12 = vadd.f32 %v1185_v9, %v1136_v15  ;;  %v1722_v9 = vld [vmem:[%s2832_s2 + $0x238] sm:$0xff] }
 0xa82   :  { %v1348_v6 = vpop.permute.xlu1 %1347  ;;  %1848 = vset.pattern.permute.xlu2 %v1900_v56 }
 0xa83   :  { %v1360_v23 = vmul.f32 %v1697_v14, %v1348_v6  ;;  %v1283_v11 = vpop.permute.xlu2 %1282  ;;  %1514 = vperm.xlu2 %1848, %v2389_v30   ;;  %v1078_v30 = vmul.f32 %v1045_v31, %v1030_v21  ;;  %v1157_v6 = vpop.permute.xlu0 %1156 }
 0xa84   :  { %v1301_v25 = vmul.f32 %v1687_v18, %v1283_v11  ;;  %1849 = vset.pattern.permute.xlu1 %v1897_v55  ;;  %v1668_v11 = vld [vmem:[%s2832_s2 + $0x88] sm:$0xff] }
 0xa85   :  { %v2621_v26 = vadd.f32 %v1360_v23, %v1311_v61  ;;  %1327 = vperm.xlu1 %1849, %v2430_v2   ;;  %v1695_v61 = vld [vmem:[%s2832_s2 + $0x160] sm:$0xff] }
 0xa86   :  { %v2624_v29 = vadd.f32 %v1301_v25, %v1252_v10  ;;  %v1426_v10 = vadd.f32 %v1418_v50, %v2558_v39  ;;  %v1184_v25 = vmul.f32 %v1668_v11, %v1157_v6  ;;  %v1675_v39 = vld [vmem:[%s2832_s2 + $0xc0] sm:$0xff] }
 0xa8b   :  { %v1100_v33 = vpop.permute.xlu1 %1099  ;;  %1850 = vset.pattern.permute.xlu2 %v1899_v27 }
 0xa8c   :  { %v1127_v20 = vmul.f32 %v1660_v32, %v1100_v33  ;;  %v1466_v34 = vpop.permute.xlu2 %1465  ;;  %1388 = vperm.xlu2 %1850, %v2442_v24  }
 0xa8d   :  { %1852 = vset.pattern.permute.xlu1 %v1900_v56  ;;  %v1475_v19 = vmul.f32 %v1714_v3, %v1466_v34  ;;  %v1711_v3 = vld [vmem:[%s2832_s2 + $0x1e0] sm:$0xff] }
 0xa8e   :  { %v2635_v35 = vadd.f32 %v1127_v20, %v1078_v30  ;;  %1510 = vperm.xlu1 %1852, %v2398_v22   ;;  %v1462_v30 = vpop.permute.xlu0 %1461 }
 0xa8f   :  { %v1483_v13 = vadd.f32 %v1475_v19, %v1426_v10 }
 0xa90   :  { %v1192_v21 = vadd.f32 %v1184_v25, %v2635_v35 }
 0xa94   :  { %v1222_v38 = vpop.permute.xlu1 %1221  ;;  %1853 = vset.pattern.permute.xlu2 %v1897_v55 }
 0xa95   :  { %v1243_v54 = vmul.f32 %v1678_v37, %v1222_v38  ;;  %1323 = vperm.xlu2 %1853, %v2476_v59   ;;  %v1096_v41 = vpop.permute.xlu2 %1095  ;;  %v1696_v37 = vld [vmem:[%s2832_s2 + $0x168] sm:$0xff] }
 0xa96   :  { %1854 = vset.pattern.permute.xlu1 %v1899_v27  ;;  %v1659_v27 = vld [vmem:[%s2832_s2 + $0x40] sm:$0xff] }
 0xa97   :  { %v1251_v22 = vadd.f32 %v1243_v54, %v1194_v40  ;;  %1384 = vperm.xlu1 %1854, %v2430_v2   ;;  %v1704_v40 = vld [vmem:[%s2832_s2 + $0x1a8] sm:$0xff]  ;;  %v1359_v54 = vmul.f32 %v1696_v37, %v1344_v0 }
 0xa98   :  { %v1692_v37 = vld [vmem:[%s2832_s2 + $0x148] sm:$0xff] }
 0xa9d   :  { %v2652_v43 = vpop.permute.xlu1 %1404  ;;  %1855 = vset.pattern.permute.xlu2 %v1898_v48  ;;  %v1126_v48 = vmul.f32 %v1659_v27, %v1096_v41  ;;  %v1336_v41 = vpop.permute.xlu0 %1335  ;;  %v1367_v27 = vadd.f32 %v1359_v54, %v2586_v5 }
 0xa9e   :  { %1445 = vperm.xlu2 %1855, %v2442_v24   ;;  %v1279_v55 = vpop.permute.xlu2 %1278  ;;  %v1417_v35 = vmul.f32 %v1705_v36, %v2652_v43  ;;  %v1693_v36 = vld [vmem:[%s2832_s2 + $0x150] sm:$0xff] }
 0xa9f   :  { %v1300_v47 = vmul.f32 %v1686_v42, %v1279_v55  ;;  %1380 = vperm.xlu1 %1854, %v2476_v59   ;;  %v1713_v42 = vld [vmem:[%s2832_s2 + $0x1f0] sm:$0xff] }
 0xaa1   :  { %v2657_v44 = vadd.f32 %v1300_v47, %v1251_v22  ;;  %v1712_v22 = vld [vmem:[%s2832_s2 + $0x1e8] sm:$0xff]  ;;  %v1425_v47 = vadd.f32 %v1417_v35, %v2621_v26 }
 0xaa5   :  { %v1271_v5 = vpop.permute.xlu0 %1270 }
 0xaa6   :  { %v1040_v45 = vpop.permute.xlu1 %1039  ;;  %1441 = vperm.xlu2 %1855, %v2430_v2  }
 0xaa7   :  { %v1077_v46 = vmul.f32 %v1040_v45, %v1029_v17  ;;  %1857 = vset.pattern.permute.xlu1 %v1900_v56  ;;  %v1401_v51 = vpop.permute.xlu2 %1400  ;;  %v1721_v17 = vld [vmem:[%s2832_s2 + $0x230] sm:$0xff]  ;;  %v1474_v45 = vmul.f32 %v1713_v42, %v1462_v30  ;;  %v1684_v30 = vld [vmem:[%s2832_s2 + $0x108] sm:$0xff] }
 0xaa8   :  { %1502 = vperm.xlu1 %1857, %v2442_v24   ;;  %v1416_v55 = vmul.f32 %v1704_v40, %v1401_v51 }
 0xaa9   :  { %v1134_v49 = vadd.f32 %v1126_v48, %v1077_v46  ;;  %v1720_v48 = vld [vmem:[%s2832_s2 + $0x228] sm:$0xff] }
 0xaaa   :  { %v1424_v46 = vadd.f32 %v1416_v55, %v1367_v27  ;;  %v1709_v55 = vld [vmem:[%s2832_s2 + $0x1d0] sm:$0xff]  ;;  %v1683_v27 = vld [vmem:[%s2832_s2 + $0x100] sm:$0xff] }
 0xaae   :  { %1437 = vperm.xlu2 %1855, %v2476_v59  }
 0xaaf   :  { %v1218_v8 = vpop.permute.xlu1 %1217 }
 0xab0   :  { %v1242_v2 = vmul.f32 %v1677_v52, %v1218_v8  ;;  %1494 = vperm.xlu1 %1857, %v2476_v59   ;;  %v1153_v57 = vpop.permute.xlu2 %1152  ;;  %v1482_v52 = vadd.f32 %v1474_v45, %v1425_v47 }
 0xab1   :  { %v1183_v56 = vmul.f32 %v1667_v28, %v1153_v57 }
 0xab2   :  { %v1250_v60 = vadd.f32 %v1242_v2, %v2610_v12 }
 0xab3   :  { %v1191_v24 = vadd.f32 %v1183_v56, %v1134_v49 }
 0xab8   :  { %v1340_v63 = vpop.permute.xlu1 %1339 }
 0xab9   :  { %v1358_v59 = vmul.f32 %v1695_v61, %v1340_v63  ;;  %v1275_v1 = vpop.permute.xlu2 %1274  ;;  %v1702_v63 = vld [vmem:[%s2832_s2 + $0x198] sm:$0xff] }
 0xaba   :  { %v1299_v15 = vmul.f32 %v1685_v62, %v1275_v1  ;;  %v1694_v62 = vld [vmem:[%s2832_s2 + $0x158] sm:$0xff] }
 0xabb   :  { %v2690_v4 = vadd.f32 %v1358_v59, %v2624_v29  ;;  %v1703_v59 = vld [vmem:[%s2832_s2 + $0x1a0] sm:$0xff]  ;;  %v1357_v1 = vmul.f32 %v1694_v62, %v1336_v41  ;;  %v1701_v41 = vld [vmem:[%s2832_s2 + $0x190] sm:$0xff] }
 0xabc   :  { %v2693_v7 = vadd.f32 %v1299_v15, %v1250_v60  ;;  %v1267_v60 = vpop.permute.xlu0 %1266 }
 0xabd   :  { %v1365_v19 = vadd.f32 %v1357_v1, %v2657_v44 }
 0xac1   :  { %v1523_v12 = vpop.permute.xlu1 %1522 }
 0xac2   :  { %v1532_v14 = vmul.f32 %v1722_v9, %v1523_v12  ;;  %v1458_v18 = vpop.permute.xlu2 %1457  ;;  %v1710_v9 = vld [vmem:[%s2832_s2 + $0x1d8] sm:$0xff] }
 0xac3   :  { %v1473_v43 = vmul.f32 %v1712_v22, %v1458_v18 }
 0xac4   :  { %v1540_v23 = vadd.f32 %v1532_v14, %v1483_v13  ;;  %v1450_v61 = vpop.permute.xlu0 %1449  ;;  %v1719_v13 = vld [vmem:[%s2832_s2 + $0x220] sm:$0xff] }
 0xac5   :  { %v1481_v51 = vadd.f32 %v1473_v43, %v1424_v46  ;;  %v1471_v14 = vmul.f32 %v1710_v9, %v1450_v61 }
 0xac6   :  { %1556 = vmatpush.msra.mxu1 %v1540_v23  ;;  %v1718_v23 = vld [vmem:[%s2832_s2 + $0x218] sm:$0xff] }
 0xaca   :  { %v1214_v29 = vpop.permute.xlu1 %1213 }
 0xacb   :  { %v1241_v31 = vmul.f32 %v1676_v58, %v1214_v29  ;;  %v1210_v32 = vpop.permute.xlu2 %1209 }
 0xacc   :  { %v1240_v33 = vmul.f32 %v1675_v39, %v1210_v32  ;;  %v1507_v18 = vpop.permute.xlu0 %1506  ;;  %v1572_v32 = vld [vmem:[%s2834_s4 + $0x18] sm:$0xff] }
 0xacd   :  { %v2709_v20 = vadd.f32 %v1241_v31, %v1192_v21  ;;  %v1528_v29 = vmul.f32 %v1718_v23, %v1507_v18  ;;  %1593 = vmatpush.msrb.mxu3 %v1572_v32  ;;  %v1570_v18 = vld [vmem:[%s2834_s4 + $0x8] sm:$0xff]  ;;  %v11_v23 = vstv %s2835_s5 }
 0xace   :  { %v2711_v34 = vadd.f32 %v1240_v33, %v1191_v24  ;;  %12 = vst [vmem:[#allocation2] sm:$0x1] %v11_v23 }
 0xad3   :  { %v1397_v16 = vpop.permute.xlu1 %1396 }
 0xad4   :  { %v1393_v38 = vpop.permute.xlu2 %1392  ;;  %v1415_v50 = vmul.f32 %v1703_v59, %v1397_v16  ;;  %v1700_v16 = vld [vmem:[%s2832_s2 + $0x188] sm:$0xff]  ;;  %v1707_v59 = vld [vmem:[%s2832_s2 + $0x1c0] sm:$0xff] }
 0xad5   :  { %v1414_v15 = vmul.f32 %v1702_v63, %v1393_v38  ;;  %v1298_v38 = vmul.f32 %v1684_v30, %v1271_v5 }
 0xad6   :  { %v1423_v6 = vadd.f32 %v1415_v50, %v2690_v4 }
 0xad7   :  { %v1422_v10 = vadd.f32 %v1414_v15, %v1365_v19  ;;  %v1306_v22 = vadd.f32 %v1298_v38, %v2709_v20  ;;  %v1708_v20 = vld [vmem:[%s2832_s2 + $0x1c8] sm:$0xff] }
 0xad9   :  { %v1479_v58 = vadd.f32 %v1471_v14, %v1422_v10  ;;  %v1571_v14 = vld [vmem:[%s2834_s4 + $0x10] sm:$0xff] }
 0xada   :  { %1594 = vmatpush.msrb.mxu3 %v1571_v14 }
 0xadb   :  { %v1536_v31 = vadd.f32 %v1528_v29, %v1479_v58 }
 0xadc   :  { %v1519_v49 = vpop.permute.xlu1 %1518  ;;  %1595 = vmatpush.msrb.mxu3 %v1570_v18 }
 0xadd   :  { %v1531_v28 = vmul.f32 %v1721_v17, %v1519_v49  ;;  %v1515_v8 = vpop.permute.xlu2 %1514 }
 0xade   :  { %v1530_v2 = vmul.f32 %v1720_v48, %v1515_v8  ;;  %v1691_v48 = vld [vmem:[%s2832_s2 + $0x140] sm:$0xff] }
 0xadf   :  { %v1539_v26 = vadd.f32 %v1531_v28, %v1482_v52  ;;  %v1297_v52 = vmul.f32 %v1683_v27, %v1267_v60  ;;  %v1699_v28 = vld [vmem:[%s2832_s2 + $0x180] sm:$0xff] }
 0xae0   :  { %v1538_v57 = vadd.f32 %v1530_v2, %v1481_v51 }
 0xae1   :  { %1557 = vmatpush.msra.mxu1 %v1539_v26  ;;  %v1716_v26 = vld [vmem:[%s2832_s2 + $0x208] sm:$0xff]  ;;  %v1305_v5 = vadd.f32 %v1297_v52, %v2711_v34  ;;  %v1715_v34 = vld [vmem:[%s2832_s2 + $0x200] sm:$0xff] }
 0xae3   :  { %1558 = vmatpush.msra.mxu1 %v1538_v57  ;;  %v1499_v57 = vpop.permute.xlu0 %1498 }
 0xae4   :  { %v1526_v63 = vmul.f32 %v1716_v26, %v1499_v57 }
 0xae5   :  { %v1332_v56 = vpop.permute.xlu1 %1331 }
 0xae6   :  { %v1389_v0 = vpop.permute.xlu2 %1388  ;;  %v1356_v35 = vmul.f32 %v1693_v36, %v1332_v56 }
 0xae7   :  { %v1413_v17 = vmul.f32 %v1701_v41, %v1389_v0 }
 0xae8   :  { %v1364_v43 = vadd.f32 %v1356_v35, %v2693_v7  ;;  %v1717_v7 = vld [vmem:[%s2832_s2 + $0x210] sm:$0xff] }
 0xaea   :  { %v1421_v8 = vadd.f32 %v1413_v17, %v1364_v43 }
 0xaee   :  { %v1454_v24 = vpop.permute.xlu1 %1453 }
 0xaef   :  { %v1472_v12 = vmul.f32 %v1711_v3, %v1454_v24  ;;  %v1324_v11 = vpop.permute.xlu2 %1323 }
 0xaf0   :  { %v1354_v51 = vmul.f32 %v1691_v48, %v1324_v11  ;;  %v1858_v11 = vld [vmem:[%s2833_s3] ss:$0 sm:$0xff] }
 0xaf1   :  { %v1480_v25 = vadd.f32 %v1472_v12, %v1423_v6  ;;  %v1569_v6 = vld [vmem:[%s2834_s4] sm:$0xff] }
 0xaf2   :  { %v1362_v0 = vadd.f32 %v1354_v51, %v1305_v5  ;;  %1596 = vmatpush.msrb.mxu3 %v1569_v6 }
 0xaf7   :  { %v1328_v53 = vpop.permute.xlu1 %1327 }
 0xaf8   :  { %v1446_v4 = vpop.permute.xlu2 %1445  ;;  %v1355_v40 = vmul.f32 %v1692_v37, %v1328_v53 }
 0xaf9   :  { %v1470_v46 = vmul.f32 %v1709_v55, %v1446_v4 }
 0xafa   :  { %v1363_v45 = vadd.f32 %v1355_v40, %v1306_v22 }
 0xafb   :  { %v1478_v60 = vadd.f32 %v1470_v46, %v1421_v8 }
 0xb00   :  { %v1511_v44 = vpop.permute.xlu1 %1510  ;;  %v1442_v47 = vpop.permute.xlu2 %1441 }
 0xb01   :  { %v1529_v39 = vmul.f32 %v1719_v13, %v1511_v44  ;;  %v1469_v2 = vmul.f32 %v1708_v20, %v1442_v47  ;;  %v48_v13 = vld [vmem:[%s2830_s1 + $0xb0] sm:$0x3] }
 0xb03   :  { %v1537_v21 = vadd.f32 %v1529_v39, %v1480_v25  ;;  %v1859_v39 = vld [vmem:[#allocation2] ss:$0 sm:$0xff] }
 0xb05   :  { %1559 = vmatpush.msra.mxu1 %v1537_v21 }
 0xb07   :  { %1560 = vmatpush.msra.mxu1 %v1536_v31 }
 0xb08   :  { %v1438_v1 = vpop.permute.xlu2 %1437 }
 0xb09   :  { %v1385_v33 = vpop.permute.xlu1 %1384  ;;  %v1468_v50 = vmul.f32 %v1707_v59, %v1438_v1 }
 0xb0a   :  { %v1412_v42 = vmul.f32 %v1700_v16, %v1385_v33 }
 0xb0c   :  { %v1420_v49 = vadd.f32 %v1412_v42, %v1363_v45 }
 0xb0e   :  { %v1477_v24 = vadd.f32 %v1469_v2, %v1420_v49 }
 0xb10   :  { %v1534_v3 = vadd.f32 %v1526_v63, %v1477_v24 }
 0xb11   :  { %v1381_v54 = vpop.permute.xlu1 %1380 }
 0xb12   :  { %v1411_v61 = vmul.f32 %v1699_v28, %v1381_v54 }
 0xb14   :  { %v1419_v15 = vadd.f32 %v1411_v61, %v1362_v0 }
 0xb16   :  { %v1476_v9 = vadd.f32 %v1468_v50, %v1419_v15 }
 0xb1a   :  { %v1503_v56 = vpop.permute.xlu1 %1502 }
 0xb1b   :  { %v1527_v62 = vmul.f32 %v1717_v7, %v1503_v56 }
 0xb1d   :  { %v1535_v53 = vadd.f32 %v1527_v62, %v1478_v60 }
 0xb1f   :  { %1561 = vmatpush.msra.mxu1 %v1535_v53 }
 0xb21   :  { %1562 = vmatpush.msra.mxu1 %v1534_v3 }
 0xb22   :  { %v1495_v19 = vpop.permute.xlu1 %1494 }
 0xb23   :  { %v1525_v10 = vmul.f32 %v1715_v34, %v1495_v19 }
 0xb25   :  { %v1533_v12 = vadd.f32 %v1525_v10, %v1476_v9 }
 0xb27   :  { %1563 = vmatpush.msra.mxu1 %v1533_v12 }
 0xb28   :  { %1723 = vmatmul.msk.f32.vlgmr.msra.gmra.mxu1 %vm355_vm9, %v48_v13  ;;  %vm1577_vm9 = vcmask 261120  }
 0xba5   :  { %v1565_v44 = vpop.f32.mrf.mxu1 }
 0xba6   :  { %v1566_v58 = vadd.f32 %v1858_v11, %v1565_v44 }
 0xba8   :  { %v1568_v25 = vmax.f32 %v1566_v58, 0.0 }
 0xbaa   :  { %1724 = vmatmul.msk.f32.vlgmr.msrb.gmra.mxu3 %vm1577_vm9, %v1568_v25 }
 0xc2d   :  { %v1598_v29 = vpop.f32.mrf.mxu3 }
 0xc2e   :  { %v1599_v21 = vadd.f32 %v1859_v39, %v1598_v29 }
 0xc30   :  { %v1725_v31 = vmul.f32 -1.442695, %v1599_v21 }
 0xc32   :  { %1876 = vpow2.f32 %v1725_v31 }
 0xc38   :  { %v1877_v32 = vpop.eup %1876 }
 0xc39   :  { %v1604_v33 = vadd.f32 1.0, %v1877_v32 }
 0xc3b   :  { %1878 = vrcp.f32 %v1604_v33  ;;  %v1616_v37 = vand.u32 2147483648, %v1604_v33  ;;  %v1614_v38 = vand.u32 2147483647, %v1604_v33  ;;  %vm1610_vm0 = vweird.f32 %v1604_v33 }
 0xc3d   :  { %v1617_v40 = vor.u32 1.1754944e-38, %v1616_v37  ;;  %vm1615_vm3 = vcmp.eq.f32.partialorder %v1614_v38, 8.507059e+37 }
 0xc41   :  { %v1879_v4 = vpop.eup %1878 }
 0xc42   :  { %v1606_v30 = vmul.f32 %v1879_v4, %v1604_v33  ;;  %vm1611_vm15 = vweird.f32 %v1879_v4 }
 0xc43   :  { %vm1612_vm1 = vmor %vm1610_vm0, %vm1611_vm15 }
 0xc44   :  { %v1607_v36 = vsub.f32 1.0, %v1606_v30 }
 0xc46   :  { %v1608_v16 = vmul.f32 %v1879_v4, %v1607_v36 }
 0xc48   :  { %v1609_v35 = vadd.f32 %v1879_v4, %v1608_v16 }
 0xc4a   :  { %v1613_v54 = vsel %vm1612_vm1, %v1879_v4, %v1609_v35 }
 0xc4b   :  { %v1618_v41 = vsel %vm1615_vm3, %v1617_v40, %v1613_v54 }
 0xc4c   :  { %1621 = vst.msk [vmem:[%s2836_s6] sm:$0x3] %vm1620_vm2, %v1618_v41 }

</bundles_post_ra>
